<compile_context>
chip_gen: v6e
topology: v6e:2x2x1
jax: 0.10.0
libtpu: 0.0.40
codegen_flags: <defaults>
</compile_context>

<pallas_src>
import jax
import jax.numpy as jnp
from jax.experimental import pallas as pl
from jax.experimental.pallas import tpu as pltpu


def _self_attention_kernel(gamma_ref, qt_ref, k_ref, vt_ref, xt_ref,
                           out_ref, *attn_refs):
    # qt_ref: (TQ, C8p) bf16   (query rows for this tile, channels padded w/ 0)
    # k_ref:  (C8p, N)  bf16   (resident for the whole batch element)
    # vt_ref: (N, C)    bf16   (resident for the whole batch element)
    # xt_ref: (TQ, C)   f32    (residual input tile, x^T layout)
    # out_ref:(TQ, C)          attn_refs[0] (optional): (TQ, N)

    # energy[i, j] = sum_c q[i, c] * k[c, j]  -- canonical bf16 MXU matmul.
    energy = jnp.dot(qt_ref[...], k_ref[...],
                     preferred_element_type=jnp.float32)          # (TQ, N) f32

    # Numerically-stable softmax over the key axis (dim=-1).
    m = jnp.max(energy, axis=-1, keepdims=True)
    e = jnp.exp(energy - m)
    attn = e * pl.reciprocal(jnp.sum(e, axis=-1, keepdims=True), approx=True)

    # out[i, c] = sum_j attn[i, j] * v[j, c]  -- canonical bf16 MXU matmul,
    # no transposes, f32 accumulation.
    out_t = jnp.dot(attn.astype(vt_ref.dtype), vt_ref[...],
                    preferred_element_type=jnp.float32)           # (TQ, C) f32

    g = gamma_ref[0]
    out_ref[...] = (g * out_t + xt_ref[...].astype(jnp.float32)).astype(out_ref.dtype)

    if attn_refs:
        attn_refs[0][...] = attn.astype(attn_refs[0].dtype)


def _pick_tq(n, c, c8p, attn_bytes, vmem_cap):
    """Largest query tile that divides N and fits a generation-aware VMEM budget."""
    budget = int(vmem_cap * 0.45)
    # k + v^T bf16, double-buffered, resident per batch element.
    resident = 2 * 2 * n * (c8p + c)
    for tq in (512, 256, 128):
        if n % tq:
            continue
        # attn out tile (double-buffered) + energy/exp/attn f32 + bf16 attn copy
        # + q^T / x^T / out small tiles.
        per_step = tq * n * (2 * attn_bytes + 14) + 2 * tq * (2 * c8p + 8 * c)
        if resident + per_step <= budget:
            return tq
    if n % 128 == 0:
        return 128
    # Non-128-aligned N: largest multiple-of-8 divisor, else one full row block.
    for tq in range((min(512, n) // 8) * 8, 7, -8):
        if n % tq == 0:
            return tq
    return n


def self_attention(x, params, *, attn_dtype=jnp.float32, return_attention=True):
    """x: (B, C, W, H).  Returns (out (B,C,W,H), attention (B,N,N)) like the
    PyTorch module (or just `out` if return_attention=False)."""
    B, C, W, H = x.shape
    N = W * H
    C8 = C // 8
    C8p = max(8, ((C8 + 7) // 8) * 8)      # pad q/k channels to a sublane tile
    pad = C8p - C8

    try:
        vmem_cap = int(pltpu.get_tpu_info().vmem_capacity_bytes)
    except Exception:
        vmem_cap = 64 << 20                # conservative fallback (v7x)

    attn_bytes = jnp.dtype(attn_dtype).itemsize if return_attention else 0
    TQ = _pick_tq(N, C, C8p, attn_bytes, vmem_cap)
    NQ = N // TQ

    # ---- Hoisted 1x1-conv projections (tiny O(N*C^2) work, done once) ----
    x_flat = x.reshape(B, C, N)                      # (B, C, N)
    xT = jnp.swapaxes(x_flat, 1, 2)                  # (B, N, C) f32, residual

    # Zero-padded q/k rows contribute exactly 0 to the energy.
    wq_p = jnp.pad(params["wq"], ((0, pad), (0, 0)))             # (C8p, C)
    bq_p = jnp.pad(params["bq"], ((0, pad),))                    # (C8p,)
    wk_p = jnp.pad(params["wk"], ((0, pad), (0, 0)))
    bk_p = jnp.pad(params["bk"], ((0, pad),))

    qT = (jnp.einsum('bnc,oc->bno', xT, wq_p)
          + bq_p[None, None, :]).astype(jnp.bfloat16)            # (B, N, C8p)
    k = (jnp.einsum('oc,bcn->bon', wk_p, x_flat)
         + bk_p[None, :, None]).astype(jnp.bfloat16)             # (B, C8p, N)
    vT = (jnp.einsum('bnc,oc->bno', xT, params["wv"])
          + params["bv"][None, None, :]).astype(jnp.bfloat16)    # (B, N, C)

    # ---- VMEM accounting (double-buffered blocks + body intermediates) ----
    est = (2 * TQ * C8p * 2           # q^T tile (bf16)
           + 2 * C8p * N * 2          # k (bf16, batch-resident)
           + 2 * N * C * 2            # v^T (bf16, batch-resident)
           + 2 * 2 * TQ * C * 4       # x^T + out tiles (f32)
           + 2 * TQ * N * attn_bytes  # attention out tile
           + TQ * N * (3 * 4 + 2))    # energy / exp / attn f32 + bf16 copy
    vmem_limit = int(max(24 << 20, min(est + (8 << 20), int(vmem_cap * 0.68))))

    in_specs = [
        pl.BlockSpec(memory_space=pltpu.SMEM),                     # gamma (1,)
        pl.BlockSpec((None, TQ, C8p), lambda b, q: (b, q, 0)),     # q^T tile
        pl.BlockSpec((None, C8p, N), lambda b, q: (b, 0, 0)),      # k (per batch)
        pl.BlockSpec((None, N, C), lambda b, q: (b, 0, 0)),        # v^T (per batch)
        pl.BlockSpec((None, TQ, C), lambda b, q: (b, q, 0)),       # x^T tile
    ]
    out_shapes = [jax.ShapeDtypeStruct((B, N, C), x.dtype)]
    out_specs = [pl.BlockSpec((None, TQ, C), lambda b, q: (b, q, 0))]
    if return_attention:
        out_shapes.append(jax.ShapeDtypeStruct((B, N, N), attn_dtype))
        # NOTE: if the attention writeback DMA is exposed on v5e/v6e, consider
        # pipeline_mode=pl.Buffered(3) on this spec (costs TQ*N*attn_bytes VMEM).
        out_specs.append(pl.BlockSpec((None, TQ, N), lambda b, q: (b, q, 0)))

    results = pl.pallas_call(
        _self_attention_kernel,
        out_shape=tuple(out_shapes),
        grid_spec=pltpu.PrefetchScalarGridSpec(
            num_scalar_prefetch=0,
            grid=(B, NQ),
            in_specs=in_specs,
            out_specs=out_specs,
        ),
        compiler_params=pltpu.CompilerParams(
            dimension_semantics=("parallel", "parallel"),
            vmem_limit_bytes=vmem_limit,
        ),
    )(params["gamma"], qT, k, vT, xT)

    out = jnp.swapaxes(results[0], 1, 2).reshape(B, C, W, H)
    if return_attention:
        return out, results[1]
    return out


def init_params(key, in_channels):
    """Deterministic init matching the PyTorch module's parameter shapes.
    Conv2d(k=1) weight (out, in, 1, 1) is stored here as (out, in)."""
    C = in_channels
    C8 = C // 8
    k1, k2, k3, k4, k5, k6 = jax.random.split(key, 6)

    def conv_init(kw, kb, out_c, in_c):
        bound = 1.0 / jnp.sqrt(in_c)
        w = jax.random.uniform(kw, (out_c, in_c), jnp.float32, -bound, bound)
        b = jax.random.uniform(kb, (out_c,), jnp.float32, -bound, bound)
        return w, b

    wq, bq = conv_init(k1, k2, C8, C)
    wk, bk = conv_init(k3, k4, C8, C)
    wv, bv = conv_init(k5, k6, C, C)
    gamma = jnp.zeros((1,), jnp.float32)   # nn.Parameter(torch.zeros(1)), frozen
    return {"wq": wq, "bq": bq, "wk": wk, "bk": bk, "wv": wv, "bv": bv,
            "gamma": gamma}


def _reference(x, params):
    """Pure-JAX f32 reference mirroring the PyTorch forward."""
    B, C, W, H = x.shape
    N = W * H
    xf = x.reshape(B, C, N)
    q = jnp.einsum('oc,bcn->bon', params["wq"], xf) + params["bq"][None, :, None]
    k = jnp.einsum('oc,bcn->bon', params["wk"], xf) + params["bk"][None, :, None]
    v = jnp.einsum('oc,bcn->bon', params["wv"], xf) + params["bv"][None, :, None]
    energy = jnp.einsum('bci,bcj->bij', q, k)
    attn = jax.nn.softmax(energy, axis=-1)
    out = jnp.einsum('bcj,bij->bci', v, attn)
    out = params["gamma"][0] * out + xf
    return out.reshape(B, C, W, H), attn


if __name__ == "__main__":
    key = jax.random.PRNGKey(0)
    kx, kp = jax.random.split(key)

    B, C, W, H = 2, 32, 16, 16          # in_channels must be divisible by 8
    x = jax.random.normal(kx, (B, C, W, H), jnp.float32)
    params = init_params(kp, C)         # gamma = zeros(1), as in the module

    # Use a non-zero gamma for the check so the attention-output path is
    # actually exercised (with gamma=0 the residual trivially dominates).
    params = dict(params, gamma=jnp.array([0.5], jnp.float32))

    out, attention = self_attention(x, params)
    jax.block_until_ready((out, attention))

    # sanity: shapes, softmax rows sum to 1, and match the pure-JAX reference
    # (tolerances loosened vs f32 because the MXU matmuls use bf16 operands).
    assert out.shape == (B, C, W, H)
    assert attention.shape == (B, W * H, W * H)
    assert jnp.allclose(jnp.sum(attention, axis=-1), 1.0, atol=1e-2)

    ref_out, ref_attn = _reference(x, params)
    assert jnp.allclose(attention, ref_attn, atol=5e-3, rtol=5e-2), \
        float(jnp.max(jnp.abs(attention - ref_attn)))
    assert jnp.allclose(out, ref_out, atol=5e-2, rtol=5e-2), \
        float(jnp.max(jnp.abs(out - ref_out)))

    print("KERNEL_OK")
</pallas_src>

<mosaic_0001>
module attributes {stable_mosaic.version = 11 : i64} {
  func.func @_self_attention_kernel(%arg0: i32, %arg1: i32, %arg2: memref<1xf32, #tpu.memory_space<smem>>, %arg3: memref<1x256x8xbf16, #tpu.memory_space<vmem>>, %arg4: memref<1x8x256xbf16, #tpu.memory_space<vmem>>, %arg5: memref<1x256x32xbf16, #tpu.memory_space<vmem>>, %arg6: memref<1x256x32xf32, #tpu.memory_space<vmem>>, %arg7: memref<1x256x32xf32, #tpu.memory_space<vmem>>, %arg8: memref<1x256x256xf32, #tpu.memory_space<vmem>>) attributes {dimension_semantics = [#tpu.dimension_semantics<parallel>, #tpu.dimension_semantics<parallel>], iteration_bounds = array<i64: 2, 1>, scalar_prefetch = 0 : i64, scratch_operands = 0 : i64, tpu.core_type = #tpu.core_type<tc>, window_params = [{transform_indices = @transform_0, window_bounds = array<i64: 1>}, {transform_indices = @transform_1, window_bounds = array<i64: 1, 256, 8>}, {transform_indices = @transform_2, window_bounds = array<i64: 1, 8, 256>}, {transform_indices = @transform_3, window_bounds = array<i64: 1, 256, 32>}, {transform_indices = @transform_4, window_bounds = array<i64: 1, 256, 32>}, {transform_indices = @transform_5, window_bounds = array<i64: 1, 256, 32>}, {transform_indices = @transform_6, window_bounds = array<i64: 1, 256, 256>}]} {
    %c0 = arith.constant 0 : index
    %c0_0 = arith.constant 0 : index
    %c0_1 = arith.constant 0 : index
    %0 = vector.load %arg3[%c0, %c0_0, %c0_1] : memref<1x256x8xbf16, #tpu.memory_space<vmem>>, vector<1x256x8xbf16>
    %1 = vector.shape_cast %0 : vector<1x256x8xbf16> to vector<256x8xbf16>
    %c0_2 = arith.constant 0 : index
    %c0_3 = arith.constant 0 : index
    %c0_4 = arith.constant 0 : index
    %2 = vector.load %arg4[%c0_2, %c0_3, %c0_4] : memref<1x8x256xbf16, #tpu.memory_space<vmem>>, vector<1x8x256xbf16>
    %3 = vector.shape_cast %2 : vector<1x8x256xbf16> to vector<8x256xbf16>
    %cst = arith.constant dense<0.000000e+00> : vector<256x256xf32>
    %4 = tpu.matmul %1, %3, %cst {dimension_numbers = #tpu.dot_dimension_numbers<[1], [0], [0], [1], [0, 0, 1, 1], [], []>} : vector<256x8xbf16>, vector<8x256xbf16>, vector<256x256xf32> -> vector<256x256xf32>
    %cst_5 = arith.constant dense<0xFF800000> : vector<256xf32>
    %5 = vector.multi_reduction <maximumf>, %4, %cst_5 [1] : vector<256x256xf32> to vector<256xf32>
    %6 = vector.shape_cast %5 : vector<256xf32> to vector<256x1xf32>
    %7 = vector.broadcast %6 : vector<256x1xf32> to vector<256x256xf32>
    %8 = arith.subf %4, %7 : vector<256x256xf32>
    %9 = math.exp %8 : vector<256x256xf32>
    %cst_6 = arith.constant dense<0.000000e+00> : vector<256xf32>
    %10 = vector.multi_reduction <add>, %9, %cst_6 [1] : vector<256x256xf32> to vector<256xf32>
    %11 = vector.shape_cast %10 : vector<256xf32> to vector<256x1xf32>
    %12 = tpu.reciprocal %11 {approx = true} : vector<256x1xf32> -> vector<256x1xf32>
    %13 = vector.broadcast %12 : vector<256x1xf32> to vector<256x256xf32>
    %14 = arith.mulf %9, %13 : vector<256x256xf32>
    %15 = arith.truncf %14 : vector<256x256xf32> to vector<256x256xbf16>
    %c0_7 = arith.constant 0 : index
    %c0_8 = arith.constant 0 : index
    %c0_9 = arith.constant 0 : index
    %16 = vector.load %arg5[%c0_7, %c0_8, %c0_9] : memref<1x256x32xbf16, #tpu.memory_space<vmem>>, vector<1x256x32xbf16>
    %17 = vector.shape_cast %16 : vector<1x256x32xbf16> to vector<256x32xbf16>
    %cst_10 = arith.constant dense<0.000000e+00> : vector<256x32xf32>
    %18 = tpu.matmul %15, %17, %cst_10 {dimension_numbers = #tpu.dot_dimension_numbers<[1], [0], [0], [1], [0, 0, 1, 1], [], []>} : vector<256x256xbf16>, vector<256x32xbf16>, vector<256x32xf32> -> vector<256x32xf32>
    %c0_11 = arith.constant 0 : index
    %19 = memref.load %arg2[%c0_11] : memref<1xf32, #tpu.memory_space<smem>>
    %20 = vector.broadcast %19 : f32 to vector<256x32xf32>
    %21 = arith.mulf %20, %18 : vector<256x32xf32>
    %c0_12 = arith.constant 0 : index
    %c0_13 = arith.constant 0 : index
    %c0_14 = arith.constant 0 : index
    %22 = vector.load %arg6[%c0_12, %c0_13, %c0_14] : memref<1x256x32xf32, #tpu.memory_space<vmem>>, vector<1x256x32xf32>
    %23 = vector.shape_cast %22 : vector<1x256x32xf32> to vector<256x32xf32>
    %24 = arith.addf %21, %23 : vector<256x32xf32>
    %c0_15 = arith.constant 0 : index
    %c0_16 = arith.constant 0 : index
    %c0_17 = arith.constant 0 : index
    %25 = vector.load %arg7[%c0_15, %c0_16, %c0_17] : memref<1x256x32xf32, #tpu.memory_space<vmem>>, vector<1x256x32xf32>
    %26 = vector.shape_cast %25 : vector<1x256x32xf32> to vector<256x32xf32>
    %27 = vector.shape_cast %24 : vector<256x32xf32> to vector<1x256x32xf32>
    tpu.vector_store %arg7[%c0_15, %c0_16, %c0_17], %27 {strides = array<i32>} : memref<1x256x32xf32, #tpu.memory_space<vmem>>, vector<1x256x32xf32>,
    %c0_18 = arith.constant 0 : index
    %c0_19 = arith.constant 0 : index
    %c0_20 = arith.constant 0 : index
    %28 = vector.load %arg8[%c0_18, %c0_19, %c0_20] : memref<1x256x256xf32, #tpu.memory_space<vmem>>, vector<1x256x256xf32>
    %29 = vector.shape_cast %28 : vector<1x256x256xf32> to vector<256x256xf32>
    %30 = vector.shape_cast %14 : vector<256x256xf32> to vector<1x256x256xf32>
    tpu.vector_store %arg8[%c0_18, %c0_19, %c0_20], %30 {strides = array<i32>} : memref<1x256x256xf32, #tpu.memory_space<vmem>>, vector<1x256x256xf32>,
    return
  }
  func.func @transform_0(%arg0: i32, %arg1: i32) -> i32 {
    %c0_i32 = arith.constant 0 : i32
    %c0_i32_0 = arith.constant 0 : i32
    return %c0_i32 : i32
  }
  func.func @transform_1(%arg0: i32, %arg1: i32) -> (i32, i32, i32) {
    %c0_i32 = arith.constant 0 : i32
    %c0_i32_0 = arith.constant 0 : i32
    return %arg0, %arg1, %c0_i32 : i32, i32, i32
  }
  func.func @transform_2(%arg0: i32, %arg1: i32) -> (i32, i32, i32) {
    %c0_i32 = arith.constant 0 : i32
    %c0_i32_0 = arith.constant 0 : i32
    %c0_i32_1 = arith.constant 0 : i32
    return %arg0, %c0_i32, %c0_i32_0 : i32, i32, i32
  }
  func.func @transform_3(%arg0: i32, %arg1: i32) -> (i32, i32, i32) {
    %c0_i32 = arith.constant 0 : i32
    %c0_i32_0 = arith.constant 0 : i32
    %c0_i32_1 = arith.constant 0 : i32
    return %arg0, %c0_i32, %c0_i32_0 : i32, i32, i32
  }
  func.func @transform_4(%arg0: i32, %arg1: i32) -> (i32, i32, i32) {
    %c0_i32 = arith.constant 0 : i32
    %c0_i32_0 = arith.constant 0 : i32
    return %arg0, %arg1, %c0_i32 : i32, i32, i32
  }
  func.func @transform_5(%arg0: i32, %arg1: i32) -> (i32, i32, i32) {
    %c0_i32 = arith.constant 0 : i32
    %c0_i32_0 = arith.constant 0 : i32
    return %arg0, %arg1, %c0_i32 : i32, i32, i32
  }
  func.func @transform_6(%arg0: i32, %arg1: i32) -> (i32, i32, i32) {
    %c0_i32 = arith.constant 0 : i32
    %c0_i32_0 = arith.constant 0 : i32
    return %arg0, %arg1, %c0_i32 : i32, i32, i32
  }
}

</mosaic_0001>

<bundles_post_ra>
// kernel: tpu_custom_call.1
= control target key start
LH: loop header
LB: loop body
LE: loop exit
PB: predicated region body
PF: predicated region fallthrough
CT: control target
= control target key end

     0   :  { %s3448_s0 = inlined_call_operand.<no memory space> [shape: f32[1], index: 0, kind: input, shape index: {}]   ;;  %s3449_s1 = inlined_call_operand.vmem [shape: bf16[2,256,8], index: 1, kind: input, shape index: {}]   ;;  %s3450_s2 = inlined_call_operand.vmem [shape: bf16[2,8,256], index: 2, kind: input, shape index: {}]   ;;  %s3451_s3 = inlined_call_operand.vmem [shape: bf16[2,256,32], index: 3, kind: input, shape index: {}]   ;;  %s3452_s4 = inlined_call_operand.vmem [shape: f32[2,256,32], index: 4, kind: input, shape index: {}]   ;;  %s3453_s5 = inlined_call_operand.vmem [shape: f32[2,256,32], index: 5, kind: output, shape index: {0}]   ;;  %s3454_s6 = inlined_call_operand.hbm [shape: f32[2,256,256], index: 6, kind: output, shape index: {1}]  }
   0x1   :  { %12 = sst [smem:[#allocation2]] %s3448_s0 }
   0x2   :  { %13 = vsyncpa [#allocation4], 0 }
   0x3   :  { %15 = vsyncpa [#allocation4 + $0x1], 0  ;;  %s2544_s23 = smov 0   ;;  %s2546_s24 = smov 0  }
   0x4   :  { %s2548_s25 = smov 0   ;;  %s2550_s26 = smov 0  }
   0x5   :  { %s2552_s27 = smov 0   ;;  %s2554_s28 = smov 0  }
   0x6 LB: > { %s1934_s0 = sadd.s32 4294967295, %s2500_s28   ;;  %s1935_s29 = sadd.s32 4294967294, %s2500_s28   ;;  %s2500_s28 = sphi %s2554_s28, %s21_s28   ;;  %s2496_s27 = sphi %s2552_s27, %s3512_s27   ;;  %s2492_s26 = sphi %s2550_s26, %s3511_s26   ;;  %s2488_s25 = sphi %s2548_s25, %s3510_s25   ;;  %s2484_s24 = sphi %s2546_s24, %s3509_s24   ;;  %s2480_s23 = sphi %s2544_s23, %s3508_s23  }
   0x7   : > { %s33_s30 = sadd.s32 1, %s2496_s27  ;;  %s199_s7 = sadd.s32 1, %s2488_s25 }
   0x8   : > { %p35_p0 = scmp.ge.s32.totalorder %s33_s30, 2  ;;  %p209_p1 = scmp.ne.s32.totalorder %s2488_s25, %s2484_s24 }
   0x9   : > { %p210_p2 = scmp.eq.s32.totalorder %s1934_s0, 1  ;;  %p215_p3 = scmp.ne.s32.totalorder %s2484_s24, %s2480_s23 }
   0xa   : > { %s3514_s30 = smov (%p35_p0, %s33_s30), 0  ;;  %p216_p5 = scmp.eq.s32.totalorder %s1935_s29, 1 }
   0xb   : > { %p2584_p4 = por %p210_p2, %p209_p1  ;;  %s194_s9 = ssub.s32 %s2496_s27, %s3514_s30 }
   0xc   : > { %p1938_p6 = scmp.ge.s32.totalorder %s2500_s28, 1  ;;  %p197_p7 = scmp.eq.s32.totalorder %s194_s9, 0 }
   0xd   : > { %p2591_p8 = por %p216_p5, %p215_p3  ;;  %p279_p9 = scmp.lt.s32.totalorder %s2500_s28, 3 }
   0xe   : > { %s2597_s11 = scalar_select %p197_p7, %s2488_s25, %s199_s7  }
   0xf   : > { %p280_p10 = pnand %p1938_p6, %p279_p9 }
  0x11   : > { %283 = sbr.rel (%p280_p10) target bundleno = 946 (0x3b2), region = 40 }
  0x16   : > { %p342_p11 = scmp.lt.s32.totalorder %s2492_s26, 1  ;;  %v2502_v0 = vmov 0   ;;  %vm550_vm0 = vcmask 1043456   ;;  %vm501_vm1 = vcmask 64512   ;;  %s338_s29 = sand.u32 1, %s2484_s24   ;;  %vm1649_vm2 = vcmask 261120  }
  0x17   : > { %589 = vmatprep.mubr.bf16.mxu0 %v2502_v0  ;;  %s1939_s7 = sshll.u32 %s338_s29, 9 }
  0x18   : > { %s2601_s12 = scalar_select %p342_p11, %s2492_s26, 1 }
  0x19   : > { %s3083_s9 = scalar_lea.vmem [#allocation3], %s1939_s7 }
  0x1a   : > { %s2007_s13 = sshll.u32 %s2601_s12, 3  ;;  %s2006_s14 = sshll.u32 %s2601_s12, 7 }
  0x1b   : > { %s355_s17 = scalar_lea.vmem %s3450_s2, %s2007_s13  ;;  %s2613_s20 = scalar_lea.vmem %s3449_s1, %s2006_s14 }
  0x1c   : > { %v415_v1 = vld [vmem:[%s355_s17] sm:$0xff]  ;;  %v2201_v6 = vld [vmem:[%s2613_s20 + $0x8] sm:$0xff]   ;;  %v2202_v7 = vld [vmem:[%s2613_s20 + $0x10] sm:$0xff]   ;;  %s2816_s0 = scalar_lea.vmem %s3451_s3, %s2006_s14  ;;  %s1551_s13 = sld [smem:[#allocation2]] }
  0x1d   : > { %v1967_v2 = vcombine.high %v415_v1, %v415_v1  ;;  %v1966_v3 = vcombine.low %v415_v1, %v415_v1  ;;  %v2200_v5 = vld [vmem:[%s2613_s20] sm:$0xff]   ;;  %v2203_v8 = vld [vmem:[%s2613_s20 + $0x18] sm:$0xff]   ;;  %v2205_v10 = vld [vmem:[%s2613_s20 + $0x28] sm:$0xff]   ;;  %s2009_s14 = sshll.u32 %s2601_s12, 8  ;;  %s1776_s7 = sshll.u32 %s3083_s9, 4  ;;  %s3330_s7 = int_to_ptr.vmem [resolvable:$true] %s1776_s7 }
  0x1e   : > { %v2204_v9 = vld [vmem:[%s2613_s20 + $0x20] sm:$0xff]   ;;  %v2206_v11 = vld [vmem:[%s2613_s20 + $0x30] sm:$0xff]   ;;  %v2207_v12 = vld [vmem:[%s2613_s20 + $0x38] sm:$0xff]   ;;  %s3255_s17 = scalar_lea.vmem %s3452_s4, %s2009_s14  ;;  %s3264_s12 = scalar_lea.vmem %s3453_s5, %s2009_s14 }
  0x1f   : > { %1968 = vmatprep.subr.msk.bf16.mxu0 %vm550_vm0, %v1967_v2  ;;  %v552_v4 = vsel %vm550_vm0, %v1966_v3, 0  ;;  %v2208_v13 = vld [vmem:[%s2613_s20 + $0x40] sm:$0xff]   ;;  %v2209_v14 = vld [vmem:[%s2613_s20 + $0x48] sm:$0xff]   ;;  %v2210_v15 = vld [vmem:[%s2613_s20 + $0x50] sm:$0xff]  }
  0x20   : > { %572 = vmatpush1.bf16.msra.mxu0 %v552_v4  ;;  %v2211_v16 = vld [vmem:[%s2613_s20 + $0x58] sm:$0xff]   ;;  %v2212_v17 = vld [vmem:[%s2613_s20 + $0x60] sm:$0xff]   ;;  %v2213_v18 = vld [vmem:[%s2613_s20 + $0x68] sm:$0xff]  }
  0x21   : > { %v2214_v19 = vld [vmem:[%s2613_s20 + $0x70] sm:$0xff]   ;;  %v2215_v20 = vld [vmem:[%s2613_s20 + $0x78] sm:$0xff]   ;;  %s2011_s20 = sshll.u32 %s2492_s26, 13  ;;  %s3337_s26 = scalar_lea.sflag [#allocation4], %s338_s29 }
  0x23   : > { %1969 = vmatmul.mubr.msk.bf16.vlgmr.msra.gmra.mxu0 %vm501_vm1, %v2200_v5 }
  0x24   : > { %599 = vmatprep.mubr.bf16.mxu0 %v2502_v0 }
  0x2b   : > { %1970 = vmatmul.mubr.msk.bf16.gmra.mxu0 %vm501_vm1, %v2201_v6 }
  0x2c   : > { %609 = vmatprep.mubr.bf16.mxu0 %v2502_v0 }
  0x33   : > { %1971 = vmatmul.mubr.msk.bf16.gmra.mxu0 %vm501_vm1, %v2202_v7 }
  0x34   : > { %619 = vmatprep.mubr.bf16.mxu0 %v2502_v0 }
  0x3b   : > { %1972 = vmatmul.mubr.msk.bf16.gmra.mxu0 %vm501_vm1, %v2203_v8 }
  0x3c   : > { %629 = vmatprep.mubr.bf16.mxu0 %v2502_v0 }
  0x43   : > { %1973 = vmatmul.mubr.msk.bf16.gmra.mxu0 %vm501_vm1, %v2204_v9 }
  0x44   : > { %639 = vmatprep.mubr.bf16.mxu0 %v2502_v0 }
  0x4b   : > { %1974 = vmatmul.mubr.msk.bf16.gmra.mxu0 %vm501_vm1, %v2205_v10 }
  0x4c   : > { %649 = vmatprep.mubr.bf16.mxu0 %v2502_v0 }
  0x53   : > { %1975 = vmatmul.mubr.msk.bf16.gmra.mxu0 %vm501_vm1, %v2206_v11 }
  0x54   : > { %659 = vmatprep.mubr.bf16.mxu0 %v2502_v0 }
  0x5b   : > { %1976 = vmatmul.mubr.msk.bf16.gmra.mxu0 %vm501_vm1, %v2207_v12 }
  0x5c   : > { %669 = vmatprep.mubr.bf16.mxu0 %v2502_v0 }
  0x63   : > { %1977 = vmatmul.mubr.msk.bf16.gmra.mxu0 %vm501_vm1, %v2208_v13 }
  0x64   : > { %679 = vmatprep.mubr.bf16.mxu0 %v2502_v0 }
  0x6b   : > { %1978 = vmatmul.mubr.msk.bf16.gmra.mxu0 %vm501_vm1, %v2209_v14 }
  0x6c   : > { %689 = vmatprep.mubr.bf16.mxu0 %v2502_v0 }
  0x73   : > { %1979 = vmatmul.mubr.msk.bf16.gmra.mxu0 %vm501_vm1, %v2210_v15 }
  0x74   : > { %699 = vmatprep.mubr.bf16.mxu0 %v2502_v0 }
  0x7b   : > { %1980 = vmatmul.mubr.msk.bf16.gmra.mxu0 %vm501_vm1, %v2211_v16 }
  0x7c   : > { %709 = vmatprep.mubr.bf16.mxu0 %v2502_v0 }
  0x83   : > { %1981 = vmatmul.mubr.msk.bf16.gmra.mxu0 %vm501_vm1, %v2212_v17 }
  0x84   : > { %719 = vmatprep.mubr.bf16.mxu0 %v2502_v0 }
  0x8b   : > { %1982 = vmatmul.mubr.msk.bf16.gmra.mxu0 %vm501_vm1, %v2213_v18 }
  0x8c   : > { %729 = vmatprep.mubr.bf16.mxu0 %v2502_v0 }
  0x93   : > { %1983 = vmatmul.mubr.msk.bf16.gmra.mxu0 %vm501_vm1, %v2214_v19 }
  0x94   : > { %739 = vmatprep.mubr.bf16.mxu0 %v2502_v0 }
  0x9b   : > { %1984 = vmatmul.mubr.msk.bf16.gmra.mxu0 %vm501_vm1, %v2215_v20 }
  0xe3   : > { %v2647_v21 = vpop.f32.mrf.mxu0 }
  0xe5   : > { %v2649_v22 = vpop.f32.mrf.mxu0 }
  0xe7   : > { %v2651_v23 = vpop.f32.mrf.mxu0 }
  0xe9   : > { %v2653_v24 = vpop.f32.mrf.mxu0 }
  0xeb   : > { %v2655_v25 = vpop.f32.mrf.mxu0 }
  0xed   : > { %v2657_v26 = vpop.f32.mrf.mxu0 }
  0xee   : > { %v756_v27 = vmax.f32 %v2655_v25, %v2657_v26 }
  0xef   : > { %v2661_v28 = vpop.f32.mrf.mxu0 }
  0xf0   : > { %757 = vmax.xlane.f32.xlu0 %v756_v27 }
  0xf1   : > { %v2663_v29 = vpop.f32.mrf.mxu0 }
  0xf2   : > { %v759_v30 = vmax.f32 %v2661_v28, %v2663_v29 }
  0xf3   : > { %v2667_v31 = vpop.f32.mrf.mxu0 }
  0xf4   : > { %760 = vmax.xlane.f32.xlu0 %v759_v30 }
  0xf5   : > { %v2669_v32 = vpop.f32.mrf.mxu0 }
  0xf6   : > { %v762_v33 = vmax.f32 %v2667_v31, %v2669_v32 }
  0xf7   : > { %v2673_v34 = vpop.f32.mrf.mxu0 }
  0xf8   : > { %763 = vmax.xlane.f32.xlu1 %v762_v33 }
  0xf9   : > { %v2675_v35 = vpop.f32.mrf.mxu0 }
  0xfa   : > { %v765_v36 = vmax.f32 %v2673_v34, %v2675_v35 }
  0xfb   : > { %v2679_v37 = vpop.f32.mrf.mxu0 }
  0xfc   : > { %766 = vmax.xlane.f32.xlu1 %v765_v36 }
  0xfd   : > { %v2681_v38 = vpop.f32.mrf.mxu0 }
  0xfe   : > { %v768_v39 = vmax.f32 %v2679_v37, %v2681_v38 }
  0xff   : > { %v2685_v40 = vpop.f32.mrf.mxu0 }
 0x100   : > { %769 = vmax.xlane.f32.xlu0 %v768_v39 }
 0x101   : > { %v2687_v41 = vpop.f32.mrf.mxu0 }
 0x102   : > { %v771_v42 = vmax.f32 %v2685_v40, %v2687_v41 }
 0x103   : > { %v2691_v43 = vpop.f32.mrf.mxu0 }
 0x104   : > { %772 = vmax.xlane.f32.xlu1 %v771_v42 }
 0x105   : > { %v2693_v44 = vpop.f32.mrf.mxu0 }
 0x106   : > { %v774_v45 = vmax.f32 %v2691_v43, %v2693_v44 }
 0x107   : > { %v2697_v46 = vpop.f32.mrf.mxu0 }
 0x108   : > { %775 = vmax.xlane.f32.xlu0 %v774_v45 }
 0x109   : > { %v2699_v47 = vpop.f32.mrf.mxu0 }
 0x10a   : > { %v777_v48 = vmax.f32 %v2697_v46, %v2699_v47 }
 0x10b   : > { %v2703_v49 = vpop.f32.mrf.mxu0 }
 0x10c   : > { %778 = vmax.xlane.f32.xlu1 %v777_v48 }
 0x10d   : > { %v2705_v50 = vpop.f32.mrf.mxu0 }
 0x10e   : > { %v780_v51 = vmax.f32 %v2703_v49, %v2705_v50 }
 0x10f   : > { %v2709_v52 = vpop.f32.mrf.mxu0 }
 0x110   : > { %781 = vmax.xlane.f32.xlu0 %v780_v51 }
 0x111   : > { %v2711_v53 = vpop.f32.mrf.mxu0 }
 0x112   : > { %v783_v54 = vmax.f32 %v2709_v52, %v2711_v53 }
 0x113   : > { %v2715_v55 = vpop.f32.mrf.mxu0 }
 0x114   : > { %784 = vmax.xlane.f32.xlu1 %v783_v54 }
 0x115   : > { %v2717_v56 = vpop.f32.mrf.mxu0 }
 0x116   : > { %v786_v57 = vmax.f32 %v2715_v55, %v2717_v56 }
 0x117   : > { %v2721_v58 = vpop.f32.mrf.mxu0 }
 0x118   : > { %787 = vmax.xlane.f32.xlu0 %v786_v57 }
 0x119   : > { %v2723_v59 = vpop.f32.mrf.mxu0 }
 0x11a   : > { %v789_v60 = vmax.f32 %v2721_v58, %v2723_v59 }
 0x11b   : > { %v2727_v61 = vpop.f32.mrf.mxu0 }
 0x11c   : > { %790 = vmax.xlane.f32.xlu1 %v789_v60 }
 0x11d   : > { %v2729_v62 = vpop.f32.mrf.mxu0 }
 0x11e   : > { %v792_v63 = vmax.f32 %v2727_v61, %v2729_v62 }
 0x11f   : > { %v2733_v0 = vpop.f32.mrf.mxu0 }
 0x120   : > { %793 = vmax.xlane.f32.xlu0 %v792_v63 }
 0x121   : > { %v2735_v1 = vpop.f32.mrf.mxu0 }
 0x122   : > { %v795_v2 = vmax.f32 %v2733_v0, %v2735_v1 }
 0x123   : > { %v2739_v3 = vpop.f32.mrf.mxu0 }
 0x124   : > { %796 = vmax.xlane.f32.xlu1 %v795_v2 }
 0x125   : > { %v2741_v4 = vpop.f32.mrf.mxu0 }
 0x126   : > { %v798_v5 = vmax.f32 %v2739_v3, %v2741_v4 }
 0x127   : > { %v2745_v6 = vpop.f32.mrf.mxu0 }
 0x128   : > { %799 = vmax.xlane.f32.xlu0 %v798_v5 }
 0x129   : > { %v2747_v7 = vpop.f32.mrf.mxu0 }
 0x12a   : > { %v801_v8 = vmax.f32 %v2745_v6, %v2747_v7 }
 0x12b   : > { %v2751_v9 = vpop.f32.mrf.mxu0 }
 0x12c   : > { %802 = vmax.xlane.f32.xlu1 %v801_v8 }
 0x12d   : > { %v2753_v10 = vpop.f32.mrf.mxu0 }
 0x12e   : > { %v804_v11 = vmax.f32 %v2751_v9, %v2753_v10 }
 0x12f   : > { %v2757_v12 = vpop.f32.mrf.mxu0 }
 0x130   : > { %805 = vmax.xlane.f32.xlu0 %v804_v11 }
 0x131   : > { %v2759_v13 = vpop.f32.mrf.mxu0 }
 0x132   : > { %v807_v14 = vmax.f32 %v2757_v12, %v2759_v13 }
 0x133   : > { %v2763_v15 = vpop.f32.mrf.mxu0 }
 0x134   : > { %808 = vmax.xlane.f32.xlu1 %v807_v14 }
 0x135   : > { %v2765_v16 = vpop.f32.mrf.mxu0 }
 0x136   : > { %v810_v17 = vmax.f32 %v2763_v15, %v2765_v16 }
 0x137   : > { %v2769_v18 = vpop.f32.mrf.mxu0 }
 0x138   : > { %811 = vmax.xlane.f32.xlu0 %v810_v17  ;;  %v2216_v17 = vld [vmem:[%s2816_s0 + $0x78] sm:$0xff]  }
 0x139   : > { %v2771_v19 = vpop.f32.mrf.mxu0  ;;  %2124 = vmatprep.subr.bf16.mxu1 %v2216_v17  ;;  %2012 = vmatprep.subr.bf16.mxu0 %v2216_v17 }
 0x13a   : > { %v813_v20 = vmax.f32 %v2769_v18, %v2771_v19 }
 0x13b   : > { %v2775_v27 = vpop.f32.mrf.mxu0 }
 0x13c   : > { %814 = vmax.xlane.f32.xlu1 %v813_v20  ;;  %v2217_v20 = vld [vmem:[%s2816_s0 + $0x38] sm:$0xff]  }
 0x13d   : > { %v2777_v30 = vpop.f32.mrf.mxu0  ;;  %2132 = vmatpush3.bf16.msra.mxu1 %v2217_v20  ;;  %2013 = vmatpush3.bf16.msra.mxu0 %v2217_v20 }
 0x13e   : > { %v816_v33 = vmax.f32 %v2775_v27, %v2777_v30 }
 0x13f   : > { %v2781_v36 = vpop.f32.mrf.mxu0 }
 0x140   : > { %817 = vmax.xlane.f32.xlu0 %v816_v33  ;;  %v2218_v33 = vld [vmem:[%s2816_s0 + $0x70] sm:$0xff]  }
 0x141   : > { %v2783_v39 = vpop.f32.mrf.mxu0  ;;  %2125 = vmatprep.subr.bf16.mxu1 %v2218_v33  ;;  %2014 = vmatprep.subr.bf16.mxu0 %v2218_v33 }
 0x142   : > { %v819_v42 = vmax.f32 %v2781_v36, %v2783_v39 }
 0x143   : > { %v2787_v45 = vpop.f32.mrf.mxu0 }
 0x144   : > { %820 = vmax.xlane.f32.xlu1 %v819_v42  ;;  %v2219_v42 = vld [vmem:[%s2816_s0 + $0x30] sm:$0xff]  }
 0x145   : > { %v2789_v48 = vpop.f32.mrf.mxu0  ;;  %2133 = vmatpush3.bf16.msra.mxu1 %v2219_v42  ;;  %2015 = vmatpush3.bf16.msra.mxu0 %v2219_v42 }
 0x146   : > { %v822_v51 = vmax.f32 %v2787_v45, %v2789_v48 }
 0x147   : > { %v2793_v54 = vpop.f32.mrf.mxu0 }
 0x148   : > { %823 = vmax.xlane.f32.xlu0 %v822_v51  ;;  %v2220_v51 = vld [vmem:[%s2816_s0 + $0x68] sm:$0xff]  }
 0x149   : > { %v2795_v57 = vpop.f32.mrf.mxu0  ;;  %2126 = vmatprep.subr.bf16.mxu1 %v2220_v51  ;;  %2016 = vmatprep.subr.bf16.mxu0 %v2220_v51 }
 0x14a   : > { %3474 = vst [vmem:[#allocation6_spill] sm:$0xff] %v2795_v57  ;;  %v825_v60 = vmax.f32 %v2793_v54, %v2795_v57 }
 0x14b   : > { %v2799_v63 = vpop.f32.mrf.mxu0 }
 0x14c   : > { %3475 = vst [vmem:[#allocation7_spill] sm:$0xff] %v2799_v63  ;;  %826 = vmax.xlane.f32.xlu1 %v825_v60 }
 0x14d   : > { %v2801_v2 = vpop.f32.mrf.mxu0 }
 0x14e   : > { %3476 = vst [vmem:[#allocation8_spill] sm:$0xff] %v2801_v2  ;;  %v828_v5 = vmax.f32 %v2799_v63, %v2801_v2 }
 0x14f   : > { %v2805_v8 = vpop.f32.mrf.mxu0 }
 0x150   : > { %3477 = vst [vmem:[#allocation9_spill] sm:$0xff] %v2805_v8  ;;  %829 = vmax.xlane.f32.xlu0 %v828_v5 }
 0x151   : > { %v2807_v11 = vpop.f32.mrf.mxu0 }
 0x152   : > { %3478 = vst [vmem:[#allocation10_spill] sm:$0xff] %v2807_v11  ;;  %v831_v14 = vmax.f32 %v2805_v8, %v2807_v11 }
 0x153   : > { %v2831_v51 = vpop.f32.mrf.mxu0 }
 0x154   : > { %832 = vmax.xlane.f32.xlu1 %v831_v14 }
 0x179   : > { %v758_v60 = vpop.xlane.xlu0 %757 }
 0x17a   : > { %v850_v5 = vsub.f32 %v2655_v25, %v758_v60  ;;  %v851_v14 = vsub.f32 %v2657_v26, %v758_v60 }
 0x17c   : > { %v918_v11 = vmul.f32 1.442695, %v850_v5  ;;  %v920_v8 = vmul.f32 1.442695, %v851_v14 }
 0x17d   : > { %v761_v2 = vpop.xlane.xlu0 %760 }
 0x17e   : > { %2232 = vpow2.f32 %v918_v11  ;;  %v852_v17 = vsub.f32 %v2661_v28, %v761_v2  ;;  %v853_v20 = vsub.f32 %v2663_v29, %v761_v2 }
 0x17f   : > { %2234 = vpow2.f32 %v920_v8 }
 0x180   : > { %v922_v63 = vmul.f32 1.442695, %v852_v17  ;;  %v924_v33 = vmul.f32 1.442695, %v853_v20 }
 0x181   : > { %v764_v57 = vpop.xlane.xlu1 %763 }
 0x182   : > { %2236 = vpow2.f32 %v922_v63  ;;  %v854_v25 = vsub.f32 %v2667_v31, %v764_v57  ;;  %v855_v26 = vsub.f32 %v2669_v32, %v764_v57  ;;  %v2835_v57 = vpop.f32.mrf.mxu0 }
 0x183   : > { %2238 = vpow2.f32 %v924_v33 }
 0x184   : > { %v926_v42 = vmul.f32 1.442695, %v854_v25  ;;  %v928_v60 = vmul.f32 1.442695, %v855_v26  ;;  %v2843_v33 = vpop.f32.mrf.mxu0 }
 0x185   : > { %v767_v5 = vpop.xlane.xlu1 %766 }
 0x186   : > { %2240 = vpow2.f32 %v926_v42  ;;  %v856_v11 = vsub.f32 %v2673_v34, %v767_v5  ;;  %v857_v28 = vsub.f32 %v2675_v35, %v767_v5 }
 0x187   : > { %2242 = vpow2.f32 %v928_v60 }
 0x188   : > { %v930_v29 = vmul.f32 1.442695, %v856_v11  ;;  %v932_v2 = vmul.f32 1.442695, %v857_v28  ;;  %v834_v28 = vmax.f32 %v2831_v51, %v2835_v57 }
 0x189   : > { %v770_v8 = vpop.xlane.xlu0 %769 }
 0x18a   : > { %2244 = vpow2.f32 %v930_v29  ;;  %v858_v31 = vsub.f32 %v2679_v37, %v770_v8  ;;  %v859_v32 = vsub.f32 %v2681_v38, %v770_v8  ;;  %v2855_v29 = vpop.f32.mrf.mxu0 }
 0x18b   : > { %v2837_v63 = vpop.eup %2232  ;;  %2246 = vpow2.f32 %v932_v2 }
 0x18c   : > { %v2839_v14 = vpop.eup %2234  ;;  %v934_v34 = vmul.f32 1.442695, %v858_v31  ;;  %v936_v35 = vmul.f32 1.442695, %v859_v32 }
 0x18d   : > { %v773_v17 = vpop.xlane.xlu1 %772  ;;  %v1044_v20 = vadd.f32 %v2839_v14, %v2837_v63 }
 0x18e   : > { %2248 = vpow2.f32 %v934_v34  ;;  %v860_v37 = vsub.f32 %v2685_v40, %v773_v17  ;;  %v861_v38 = vsub.f32 %v2687_v41, %v773_v17  ;;  %v837_v17 = vmax.f32 %v2843_v33, %v2855_v29 }
 0x18f   : > { %v2847_v25 = vpop.eup %2236  ;;  %2250 = vpow2.f32 %v936_v35  ;;  %1045 = vadd.xlane.f32.xlu0 %v1044_v20  ;;  %v2869_v20 = vpop.f32.mrf.mxu0 }
 0x190   : > { %v2849_v26 = vpop.eup %2238  ;;  %v938_v42 = vmul.f32 1.442695, %v860_v37  ;;  %v940_v60 = vmul.f32 1.442695, %v861_v38  ;;  %v2221_v38 = vld [vmem:[%s2816_s0 + $0x28] sm:$0xff]  }
 0x191   : > { %v776_v5 = vpop.xlane.xlu0 %775  ;;  %v1047_v11 = vadd.f32 %v2849_v26, %v2847_v25  ;;  %2134 = vmatpush3.bf16.msra.mxu1 %v2221_v38  ;;  %2017 = vmatpush3.bf16.msra.mxu0 %v2221_v38 }
 0x192   : > { %2252 = vpow2.f32 %v938_v42  ;;  %v862_v40 = vsub.f32 %v2691_v43, %v776_v5  ;;  %v863_v41 = vsub.f32 %v2693_v44, %v776_v5 }
 0x193   : > { %v2859_v2 = vpop.eup %2240  ;;  %2254 = vpow2.f32 %v940_v60  ;;  %1048 = vadd.xlane.f32.xlu1 %v1047_v11  ;;  %835 = vmax.xlane.f32.xlu0 %v834_v28  ;;  %v750_v28 = vmax.f32 %v2647_v21, %v2649_v22 }
 0x194   : > { %v2861_v8 = vpop.eup %2242  ;;  %v942_v31 = vmul.f32 1.442695, %v862_v40  ;;  %v944_v32 = vmul.f32 1.442695, %v863_v41 }
 0x195   : > { %v779_v34 = vpop.xlane.xlu1 %778  ;;  %v1050_v35 = vadd.f32 %v2861_v8, %v2859_v2 }
 0x196   : > { %2256 = vpow2.f32 %v942_v31  ;;  %v864_v43 = vsub.f32 %v2697_v46, %v779_v34  ;;  %v865_v44 = vsub.f32 %v2699_v47, %v779_v34  ;;  %v2222_v47 = vld [vmem:[%s2816_s0 + $0x60] sm:$0xff]   ;;  %v2883_v31 = vpop.f32.mrf.mxu0 }
 0x197   : > { %v2871_v37 = vpop.eup %2244  ;;  %2258 = vpow2.f32 %v944_v32  ;;  %1051 = vadd.xlane.f32.xlu0 %v1050_v35  ;;  %838 = vmax.xlane.f32.xlu1 %v837_v17 }
 0x198   : > { %v2874_v42 = vpop.eup %2246  ;;  %v946_v60 = vmul.f32 1.442695, %v864_v43  ;;  %v948_v5 = vmul.f32 1.442695, %v865_v44  ;;  %2127 = vmatprep.subr.bf16.mxu1 %v2222_v47  ;;  %v2223_v43 = vld [vmem:[%s2816_s0 + $0x20] sm:$0xff]   ;;  %2018 = vmatprep.subr.bf16.mxu0 %v2222_v47  ;;  %v2894_v38 = vpop.f32.mrf.mxu0 }
 0x199   : > { %v782_v11 = vpop.xlane.xlu0 %781  ;;  %v1053_v46 = vadd.f32 %v2874_v42, %v2871_v37  ;;  %2135 = vmatpush3.bf16.msra.mxu1 %v2223_v43  ;;  %2019 = vmatpush3.bf16.msra.mxu0 %v2223_v43 }
 0x19a   : > { %2260 = vpow2.f32 %v946_v60  ;;  %v866_v40 = vsub.f32 %v2703_v49, %v782_v11  ;;  %v867_v41 = vsub.f32 %v2705_v50, %v782_v11  ;;  %v753_v50 = vmax.f32 %v2651_v23, %v2653_v24 }
 0x19b   : > { %v2885_v32 = vpop.eup %2248  ;;  %2262 = vpow2.f32 %v948_v5  ;;  %751 = vmax.xlane.f32.xlu0 %v750_v28  ;;  %1054 = vadd.xlane.f32.xlu1 %v1053_v46  ;;  %v2224_v28 = vld [vmem:[%s2816_s0 + $0x58] sm:$0xff]  }
 0x19c   : > { %v2887_v34 = vpop.eup %2250  ;;  %v950_v35 = vmul.f32 1.442695, %v866_v40  ;;  %v952_v17 = vmul.f32 1.442695, %v867_v41  ;;  %2128 = vmatprep.subr.bf16.mxu1 %v2224_v28  ;;  %2020 = vmatprep.subr.bf16.mxu0 %v2224_v28 }
 0x19d   : > { %v785_v44 = vpop.xlane.xlu1 %784  ;;  %v1056_v49 = vadd.f32 %v2887_v34, %v2885_v32 }
 0x19e   : > { %2264 = vpow2.f32 %v950_v35  ;;  %v868_v60 = vsub.f32 %v2709_v52, %v785_v44  ;;  %v869_v5 = vsub.f32 %v2711_v53, %v785_v44  ;;  %v840_v52 = vmax.f32 %v2869_v20, %v2883_v31  ;;  %v2225_v53 = vld [vmem:[%s2816_s0 + $0x18] sm:$0xff]  }
 0x19f   : > { %v2898_v11 = vpop.eup %2252  ;;  %2266 = vpow2.f32 %v952_v17  ;;  %1057 = vadd.xlane.f32.xlu0 %v1056_v49  ;;  %754 = vmax.xlane.f32.xlu1 %v753_v50  ;;  %v2908_v17 = vpop.f32.mrf.mxu0 }
 0x1a0   : > { %3479 = vst [vmem:[#allocation11_spill] sm:$0xff] %v2898_v11  ;;  %v2901_v46 = vpop.eup %2254  ;;  %v954_v47 = vmul.f32 1.442695, %v868_v60  ;;  %v956_v40 = vmul.f32 1.442695, %v869_v5  ;;  %2136 = vmatpush3.bf16.msra.mxu1 %v2225_v53  ;;  %2021 = vmatpush3.bf16.msra.mxu0 %v2225_v53 }
 0x1a1   : > { %v788_v41 = vpop.xlane.xlu0 %787  ;;  %v1059_v35 = vadd.f32 %v2901_v46, %v2898_v11  ;;  %v2226_v11 = vld [vmem:[%s2816_s0 + $0x50] sm:$0xff]  }
 0x1a2   : > { %2268 = vpow2.f32 %v954_v47  ;;  %v870_v43 = vsub.f32 %v2715_v55, %v788_v41  ;;  %v871_v44 = vsub.f32 %v2717_v56, %v788_v41  ;;  %v843_v55 = vmax.f32 %v2894_v38, %v2908_v17  ;;  %v2227_v56 = vld [vmem:[%s2816_s0 + $0x10] sm:$0xff]   ;;  %2129 = vmatprep.subr.bf16.mxu1 %v2226_v11  ;;  %2022 = vmatprep.subr.bf16.mxu0 %v2226_v11 }
 0x1a3   : > { %v2912_v49 = vpop.eup %2256  ;;  %2270 = vpow2.f32 %v956_v40  ;;  %1060 = vadd.xlane.f32.xlu1 %v1059_v35  ;;  %841 = vmax.xlane.f32.xlu0 %v840_v52 }
 0x1a4   : > { %v2914_v50 = vpop.eup %2258  ;;  %v958_v60 = vmul.f32 1.442695, %v870_v43  ;;  %v960_v5 = vmul.f32 1.442695, %v871_v44  ;;  %2137 = vmatpush3.bf16.msra.mxu1 %v2227_v56  ;;  %v2228_v44 = vld [vmem:[%s2816_s0 + $0x48] sm:$0xff]   ;;  %2023 = vmatpush3.bf16.msra.mxu0 %v2227_v56 }
 0x1a5   : > { %v791_v28 = vpop.xlane.xlu1 %790  ;;  %v1062_v47 = vadd.f32 %v2914_v50, %v2912_v49  ;;  %2130 = vmatprep.subr.bf16.mxu1 %v2228_v44  ;;  %2024 = vmatprep.subr.bf16.mxu0 %v2228_v44 }
 0x1a6   : > { %2272 = vpow2.f32 %v958_v60  ;;  %v872_v40 = vsub.f32 %v2721_v58, %v791_v28  ;;  %v873_v41 = vsub.f32 %v2723_v59, %v791_v28  ;;  %v2229_v59 = vld [vmem:[%s2816_s0 + $0x8] sm:$0xff]  }
 0x1a7   : > { %v2924_v35 = vpop.eup %2260  ;;  %2274 = vpow2.f32 %v960_v5  ;;  %1063 = vadd.xlane.f32.xlu0 %v1062_v47  ;;  %844 = vmax.xlane.f32.xlu1 %v843_v55 }
 0x1a8   : > { %v2926_v52 = vpop.eup %2262  ;;  %v962_v53 = vmul.f32 1.442695, %v872_v40  ;;  %v964_v43 = vmul.f32 1.442695, %v873_v41  ;;  %2138 = vmatpush3.bf16.msra.mxu1 %v2229_v59  ;;  %v2230_v40 = vld [vmem:[%s2816_s0 + $0x40] sm:$0xff]   ;;  %2025 = vmatpush3.bf16.msra.mxu0 %v2229_v59 }
 0x1a9   : > { %v794_v60 = vpop.xlane.xlu0 %793  ;;  %v1065_v58 = vadd.f32 %v2926_v52, %v2924_v35  ;;  %2131 = vmatprep.subr.bf16.mxu1 %v2230_v40  ;;  %2026 = vmatprep.subr.bf16.mxu0 %v2230_v40 }
 0x1aa   : > { %2276 = vpow2.f32 %v962_v53  ;;  %v874_v11 = vsub.f32 %v2727_v61, %v794_v60  ;;  %v875_v5 = vsub.f32 %v2729_v62, %v794_v60  ;;  %v2231_v61 = vld [vmem:[%s2816_s0] sm:$0xff]   ;;  %s3326_s0 = scalar_lea.hbm %s3454_s6, %s2011_s20 }
 0x1ab   : > { %v2934_v28 = vpop.eup %2264  ;;  %2278 = vpow2.f32 %v964_v43  ;;  %1066 = vadd.xlane.f32.xlu1 %v1065_v58 }
 0x1ac   : > { %v2936_v47 = vpop.eup %2266  ;;  %v966_v55 = vmul.f32 1.442695, %v874_v11  ;;  %v968_v56 = vmul.f32 1.442695, %v875_v5  ;;  %2139 = vmatpush3.bf16.msra.mxu1 %v2231_v61  ;;  %2027 = vmatpush3.bf16.msra.mxu0 %v2231_v61 }
 0x1ad   : > { %v797_v41 = vpop.xlane.xlu1 %796  ;;  %v1068_v53 = vadd.f32 %v2936_v47, %v2934_v28 }
 0x1ae   : > { %2280 = vpow2.f32 %v966_v55  ;;  %v876_v62 = vsub.f32 %v2733_v0, %v797_v41  ;;  %v877_v44 = vsub.f32 %v2735_v1, %v797_v41 }
 0x1af   : > { %v2944_v43 = vpop.eup %2268  ;;  %2282 = vpow2.f32 %v968_v56  ;;  %1069 = vadd.xlane.f32.xlu0 %v1068_v53 }
 0x1b0   : > { %v2946_v60 = vpop.eup %2270  ;;  %v970_v58 = vmul.f32 1.442695, %v876_v62  ;;  %v972_v59 = vmul.f32 1.442695, %v877_v44 }
 0x1b1   : > { %v800_v11 = vpop.xlane.xlu0 %799  ;;  %v1071_v5 = vadd.f32 %v2946_v60, %v2944_v43 }
 0x1b2   : > { %2284 = vpow2.f32 %v970_v58  ;;  %v878_v0 = vsub.f32 %v2739_v3, %v800_v11  ;;  %v879_v1 = vsub.f32 %v2741_v4, %v800_v11 }
 0x1b3   : > { %v2952_v55 = vpop.eup %2272  ;;  %2286 = vpow2.f32 %v972_v59  ;;  %1072 = vadd.xlane.f32.xlu1 %v1071_v5 }
 0x1b4   : > { %v2954_v56 = vpop.eup %2274  ;;  %v974_v40 = vmul.f32 1.442695, %v878_v0  ;;  %v976_v41 = vmul.f32 1.442695, %v879_v1 }
 0x1b5   : > { %v803_v53 = vpop.xlane.xlu1 %802  ;;  %v1074_v61 = vadd.f32 %v2954_v56, %v2952_v55 }
 0x1b6   : > { %2288 = vpow2.f32 %v974_v40  ;;  %v880_v62 = vsub.f32 %v2745_v6, %v803_v53  ;;  %v881_v44 = vsub.f32 %v2747_v7, %v803_v53 }
 0x1b7   : > { %v2960_v3 = vpop.eup %2276  ;;  %2290 = vpow2.f32 %v976_v41  ;;  %1075 = vadd.xlane.f32.xlu0 %v1074_v61 }
 0x1b8   : > { %v2962_v4 = vpop.eup %2278  ;;  %v978_v58 = vmul.f32 1.442695, %v880_v62  ;;  %v980_v59 = vmul.f32 1.442695, %v881_v44 }
 0x1b9   : > { %v806_v11 = vpop.xlane.xlu0 %805  ;;  %v1077_v5 = vadd.f32 %v2962_v4, %v2960_v3 }
 0x1ba   : > { %2292 = vpow2.f32 %v978_v58  ;;  %v882_v0 = vsub.f32 %v2751_v9, %v806_v11  ;;  %v883_v1 = vsub.f32 %v2753_v10, %v806_v11 }
 0x1bb   : > { %v2968_v6 = vpop.eup %2280  ;;  %2294 = vpow2.f32 %v980_v59  ;;  %1078 = vadd.xlane.f32.xlu1 %v1077_v5 }
 0x1bc   : > { %v2970_v7 = vpop.eup %2282  ;;  %v982_v40 = vmul.f32 1.442695, %v882_v0  ;;  %v984_v41 = vmul.f32 1.442695, %v883_v1 }
 0x1bd   : > { %v809_v53 = vpop.xlane.xlu1 %808  ;;  %v1080_v61 = vadd.f32 %v2970_v7, %v2968_v6 }
 0x1be   : > { %2296 = vpow2.f32 %v982_v40  ;;  %v884_v62 = vsub.f32 %v2757_v12, %v809_v53  ;;  %v885_v44 = vsub.f32 %v2759_v13, %v809_v53 }
 0x1bf   : > { %v2976_v9 = vpop.eup %2284  ;;  %2298 = vpow2.f32 %v984_v41  ;;  %1081 = vadd.xlane.f32.xlu0 %v1080_v61 }
 0x1c0   : > { %v2978_v10 = vpop.eup %2286  ;;  %v986_v58 = vmul.f32 1.442695, %v884_v62  ;;  %v988_v59 = vmul.f32 1.442695, %v885_v44 }
 0x1c1   : > { %v812_v11 = vpop.xlane.xlu0 %811  ;;  %v1083_v5 = vadd.f32 %v2978_v10, %v2976_v9 }
 0x1c2   : > { %2300 = vpow2.f32 %v986_v58  ;;  %v886_v0 = vsub.f32 %v2763_v15, %v812_v11  ;;  %v887_v1 = vsub.f32 %v2765_v16, %v812_v11 }
 0x1c3   : > { %v2984_v12 = vpop.eup %2288  ;;  %2302 = vpow2.f32 %v988_v59  ;;  %1084 = vadd.xlane.f32.xlu1 %v1083_v5 }
 0x1c4   : > { %v2986_v13 = vpop.eup %2290  ;;  %v990_v40 = vmul.f32 1.442695, %v886_v0  ;;  %v992_v41 = vmul.f32 1.442695, %v887_v1 }
 0x1c5   : > { %v815_v53 = vpop.xlane.xlu1 %814  ;;  %v1086_v61 = vadd.f32 %v2986_v13, %v2984_v12 }
 0x1c6   : > { %2304 = vpow2.f32 %v990_v40  ;;  %v888_v62 = vsub.f32 %v2769_v18, %v815_v53  ;;  %v889_v44 = vsub.f32 %v2771_v19, %v815_v53 }
 0x1c7   : > { %v2992_v15 = vpop.eup %2292  ;;  %2306 = vpow2.f32 %v992_v41  ;;  %1087 = vadd.xlane.f32.xlu0 %v1086_v61 }
 0x1c8   : > { %v2994_v16 = vpop.eup %2294  ;;  %v994_v58 = vmul.f32 1.442695, %v888_v62  ;;  %v996_v59 = vmul.f32 1.442695, %v889_v44 }
 0x1c9   : > { %v818_v11 = vpop.xlane.xlu0 %817  ;;  %v1089_v5 = vadd.f32 %v2994_v16, %v2992_v15 }
 0x1ca   : > { %2308 = vpow2.f32 %v994_v58  ;;  %v890_v0 = vsub.f32 %v2775_v27, %v818_v11  ;;  %v891_v1 = vsub.f32 %v2777_v30, %v818_v11 }
 0x1cb   : > { %v3000_v18 = vpop.eup %2296  ;;  %2310 = vpow2.f32 %v996_v59  ;;  %1090 = vadd.xlane.f32.xlu1 %v1089_v5 }
 0x1cc   : > { %v3002_v19 = vpop.eup %2298  ;;  %v998_v40 = vmul.f32 1.442695, %v890_v0  ;;  %v1000_v41 = vmul.f32 1.442695, %v891_v1 }
 0x1cd   : > { %v821_v53 = vpop.xlane.xlu1 %820  ;;  %v1092_v61 = vadd.f32 %v3002_v19, %v3000_v18 }
 0x1ce   : > { %2312 = vpow2.f32 %v998_v40  ;;  %v892_v62 = vsub.f32 %v2781_v36, %v821_v53  ;;  %v893_v44 = vsub.f32 %v2783_v39, %v821_v53 }
 0x1cf   : > { %v3008_v27 = vpop.eup %2300  ;;  %2314 = vpow2.f32 %v1000_v41  ;;  %1093 = vadd.xlane.f32.xlu0 %v1092_v61 }
 0x1d0   : > { %v3010_v30 = vpop.eup %2302  ;;  %v1002_v58 = vmul.f32 1.442695, %v892_v62  ;;  %v1004_v59 = vmul.f32 1.442695, %v893_v44  ;;  %v3482_v44 = vld [vmem:[#allocation6_spill] sm:$0xff] }
 0x1d1   : > { %v824_v11 = vpop.xlane.xlu0 %823  ;;  %v1095_v5 = vadd.f32 %v3010_v30, %v3008_v27 }
 0x1d2   : > { %2316 = vpow2.f32 %v1002_v58  ;;  %v894_v0 = vsub.f32 %v2787_v45, %v824_v11  ;;  %v895_v1 = vsub.f32 %v2789_v48, %v824_v11 }
 0x1d3   : > { %v3016_v36 = vpop.eup %2304  ;;  %2318 = vpow2.f32 %v1004_v59  ;;  %1096 = vadd.xlane.f32.xlu1 %v1095_v5 }
 0x1d4   : > { %3480 = vst [vmem:[#allocation12_spill] sm:$0xff] %v3016_v36  ;;  %v3018_v39 = vpop.eup %2306  ;;  %v1006_v40 = vmul.f32 1.442695, %v894_v0  ;;  %v1008_v41 = vmul.f32 1.442695, %v895_v1  ;;  %v3485_v1 = vld [vmem:[#allocation7_spill] sm:$0xff] }
 0x1d5   : > { %3481 = vst [vmem:[#allocation13_spill] sm:$0xff] %v3018_v39  ;;  %v827_v53 = vpop.xlane.xlu1 %826  ;;  %v1098_v61 = vadd.f32 %v3018_v39, %v3016_v36 }
 0x1d6   : > { %2320 = vpow2.f32 %v1006_v40  ;;  %v896_v62 = vsub.f32 %v2793_v54, %v827_v53  ;;  %v897_v58 = vsub.f32 %v3482_v44, %v827_v53  ;;  %v3486_v40 = vld [vmem:[#allocation8_spill] sm:$0xff] }
 0x1d7   : > { %v3024_v45 = vpop.eup %2308  ;;  %2322 = vpow2.f32 %v1008_v41  ;;  %1099 = vadd.xlane.f32.xlu0 %v1098_v61 }
 0x1d8   : > { %3483 = vst [vmem:[#allocation6_spill] sm:$0xff] %v3024_v45  ;;  %v3026_v48 = vpop.eup %2310  ;;  %v1010_v59 = vmul.f32 1.442695, %v896_v62  ;;  %v1012_v11 = vmul.f32 1.442695, %v897_v58  ;;  %v3487_v58 = vld [vmem:[#allocation9_spill] sm:$0xff] }
 0x1d9   : > { %3484 = vst [vmem:[#allocation14_spill] sm:$0xff] %v3026_v48  ;;  %v830_v5 = vpop.xlane.xlu0 %829  ;;  %v1101_v0 = vadd.f32 %v3026_v48, %v3024_v45 }
 0x1da   : > { %2324 = vpow2.f32 %v1010_v59  ;;  %v898_v36 = vsub.f32 %v3485_v1, %v830_v5  ;;  %v899_v39 = vsub.f32 %v3486_v40, %v830_v5  ;;  %v3488_v59 = vld [vmem:[#allocation10_spill] sm:$0xff] }
 0x1db   : > { %v3032_v54 = vpop.eup %2312  ;;  %2326 = vpow2.f32 %v1012_v11  ;;  %1102 = vadd.xlane.f32.xlu1 %v1101_v0 }
 0x1dc   : > { %v3034_v53 = vpop.eup %2314  ;;  %v1014_v41 = vmul.f32 1.442695, %v898_v36  ;;  %v1016_v61 = vmul.f32 1.442695, %v899_v39 }
 0x1dd   : > { %v833_v44 = vpop.xlane.xlu1 %832  ;;  %v1104_v62 = vadd.f32 %v3034_v53, %v3032_v54 }
 0x1de   : > { %2328 = vpow2.f32 %v1014_v41  ;;  %v900_v45 = vsub.f32 %v3487_v58, %v833_v44  ;;  %v901_v48 = vsub.f32 %v3488_v59, %v833_v44 }
 0x1df   : > { %v3040_v1 = vpop.eup %2316  ;;  %2330 = vpow2.f32 %v1016_v61  ;;  %1105 = vadd.xlane.f32.xlu0 %v1104_v62 }
 0x1e0   : > { %v3042_v5 = vpop.eup %2318  ;;  %v1018_v11 = vmul.f32 1.442695, %v900_v45  ;;  %v1020_v0 = vmul.f32 1.442695, %v901_v48 }
 0x1e1   : > { %v1107_v36 = vadd.f32 %v3042_v5, %v3040_v1 }
 0x1e2   : > { %2332 = vpow2.f32 %v1018_v11 }
 0x1e3   : > { %v3046_v39 = vpop.eup %2320  ;;  %2334 = vpow2.f32 %v1020_v0  ;;  %1108 = vadd.xlane.f32.xlu1 %v1107_v36 }
 0x1e4   : > { %3489 = vst [vmem:[#allocation7_spill] sm:$0xff] %v3046_v39  ;;  %v3048_v40 = vpop.eup %2322 }
 0x1e5   : > { %3490 = vst [vmem:[#allocation8_spill] sm:$0xff] %v3048_v40  ;;  %v1110_v41 = vadd.f32 %v3048_v40, %v3046_v39 }
 0x1e7   : > { %v3052_v44 = vpop.eup %2324  ;;  %1111 = vadd.xlane.f32.xlu0 %v1110_v41 }
 0x1e8   : > { %3491 = vst [vmem:[#allocation9_spill] sm:$0xff] %v3052_v44  ;;  %v3054_v61 = vpop.eup %2326 }
 0x1e9   : > { %3492 = vst [vmem:[#allocation10_spill] sm:$0xff] %v3054_v61  ;;  %v1113_v45 = vadd.f32 %v3054_v61, %v3052_v44 }
 0x1eb   : > { %v3058_v48 = vpop.eup %2328  ;;  %1114 = vadd.xlane.f32.xlu1 %v1113_v45 }
 0x1ec   : > { %3493 = vst [vmem:[#allocation15_spill] sm:$0xff] %v3058_v48  ;;  %v3060_v62 = vpop.eup %2330 }
 0x1ed   : > { %3494 = vst [vmem:[#allocation16_spill] sm:$0xff] %v3060_v62  ;;  %v1116_v58 = vadd.f32 %v3060_v62, %v3058_v48 }
 0x1ef   : > { %v3064_v59 = vpop.eup %2332  ;;  %1117 = vadd.xlane.f32.xlu0 %v1116_v58 }
 0x1f0   : > { %3495 = vst [vmem:[#allocation17_spill] sm:$0xff] %v3064_v59  ;;  %v3066_v11 = vpop.eup %2334 }
 0x1f1   : > { %v1119_v0 = vadd.f32 %v3066_v11, %v3064_v59 }
 0x1f3   : > { %1120 = vadd.xlane.f32.xlu1 %v1119_v0 }
 0x218   : > { %v1046_v36 = vpop.xlane.xlu0 %1045 }
 0x219   : > { %2336 = vrcp.f32 %v1046_v36 }
 0x21c   : > { %v1049_v41 = vpop.xlane.xlu1 %1048  ;;  %v836_v44 = vpop.xlane.xlu0 %835 }
 0x21d   : > { %2338 = vrcp.f32 %v1049_v41  ;;  %v902_v45 = vsub.f32 %v2831_v51, %v836_v44  ;;  %v903_v48 = vsub.f32 %v2835_v57, %v836_v44 }
 0x21f   : > { %v1022_v62 = vmul.f32 1.442695, %v902_v45  ;;  %v1024_v61 = vmul.f32 1.442695, %v903_v48 }
 0x220   : > { %v1052_v39 = vpop.xlane.xlu0 %1051  ;;  %v839_v58 = vpop.xlane.xlu1 %838 }
 0x221   : > { %2340 = vpow2.f32 %v1022_v62  ;;  %v904_v40 = vsub.f32 %v2843_v33, %v839_v58  ;;  %v905_v0 = vsub.f32 %v2855_v29, %v839_v58 }
 0x222   : > { %2342 = vpow2.f32 %v1024_v61 }
 0x223   : > { %2344 = vrcp.f32 %v1052_v39  ;;  %v1026_v36 = vmul.f32 1.442695, %v904_v40  ;;  %v1028_v59 = vmul.f32 1.442695, %v905_v0 }
 0x224   : > { %v752_v41 = vpop.xlane.xlu0 %751  ;;  %v1055_v51 = vpop.xlane.xlu1 %1054 }
 0x225   : > { %2346 = vpow2.f32 %v1026_v36  ;;  %v846_v57 = vsub.f32 %v2647_v21, %v752_v41  ;;  %v847_v44 = vsub.f32 %v2649_v22, %v752_v41 }
 0x226   : > { %v2337_v48 = vpop.eup %2336  ;;  %2348 = vpow2.f32 %v1028_v59 }
 0x227   : > { %v910_v62 = vmul.f32 1.442695, %v846_v57  ;;  %v912_v45 = vmul.f32 1.442695, %v847_v44  ;;  %2350 = vrcp.f32 %v1055_v51  ;;  %v1171_v33 = vmul.f32 %v2337_v48, %v2839_v14 }
 0x228   : > { %v1058_v29 = vpop.xlane.xlu0 %1057  ;;  %v755_v39 = vpop.xlane.xlu1 %754  ;;  %v1170_v40 = vmul.f32 %v2337_v48, %v2837_v63 }
 0x229   : > { %2352 = vpow2.f32 %v910_v62  ;;  %v848_v61 = vsub.f32 %v2651_v23, %v755_v39  ;;  %v849_v58 = vsub.f32 %v2653_v24, %v755_v39  ;;  %1687 = vst [vmem:[%s3083_s9 + $0x28] sm:$0xff] %v1171_v33 }
 0x22a   : > { %v2339_v21 = vpop.eup %2338  ;;  %2354 = vpow2.f32 %v912_v45  ;;  %1686 = vst [vmem:[%s3083_s9 + $0x20] sm:$0xff] %v1170_v40 }
 0x22b   : > { %2356 = vrcp.f32 %v1058_v29  ;;  %v914_v22 = vmul.f32 1.442695, %v848_v61  ;;  %v916_v14 = vmul.f32 1.442695, %v849_v58  ;;  %v1173_v63 = vmul.f32 %v2339_v21, %v2849_v26 }
 0x22c   : > { %v1061_v59 = vpop.xlane.xlu1 %1060  ;;  %v842_v0 = vpop.xlane.xlu0 %841  ;;  %v1172_v23 = vmul.f32 %v2339_v21, %v2847_v25 }
 0x22d   : > { %2358 = vpow2.f32 %v914_v22  ;;  %v906_v24 = vsub.f32 %v2869_v20, %v842_v0  ;;  %v907_v36 = vsub.f32 %v2883_v31, %v842_v0  ;;  %v1233_v41 = vpack.c.bf16 %v1173_v63, %v1171_v33  ;;  %1689 = vst [vmem:[%s3083_s9 + $0x38] sm:$0xff] %v1173_v63 }
 0x22e   : > { %v3092_v51 = vpop.eup %2340  ;;  %2360 = vpow2.f32 %v916_v14  ;;  %v1232_v57 = vpack.c.bf16 %v1172_v23, %v1170_v40  ;;  %1688 = vst [vmem:[%s3083_s9 + $0x30] sm:$0xff] %v1172_v23 }
 0x22f   : > { %v3095_v44 = vpop.eup %2342  ;;  %2362 = vrcp.f32 %v1061_v59  ;;  %v1030_v26 = vmul.f32 1.442695, %v906_v24  ;;  %v1032_v48 = vmul.f32 1.442695, %v907_v36  ;;  %1430 = vmatprep.mubr.bf16.mxu1 %v1233_v41 }
 0x230   : > { %v2345_v62 = vpop.eup %2344  ;;  %1431 = vmatmul.mubr.bf16.vlgmr.msra.gmra.mxu1 %v1232_v57  ;;  %v1064_v25 = vpop.xlane.xlu0 %1063  ;;  %v1122_v31 = vadd.f32 %v3095_v44, %v3092_v51 }
 0x231   : > { %v845_v20 = vpop.xlane.xlu1 %844  ;;  %2364 = vpow2.f32 %v1030_v26  ;;  %v1175_v29 = vmul.f32 %v2345_v62, %v2861_v8  ;;  %v1174_v40 = vmul.f32 %v2345_v62, %v2859_v2 }
 0x232   : > { %v908_v45 = vsub.f32 %v2894_v38, %v845_v20  ;;  %v909_v33 = vsub.f32 %v2908_v17, %v845_v20  ;;  %v3102_v39 = vpop.eup %2346  ;;  %2366 = vpow2.f32 %v1032_v48  ;;  %1123 = vadd.xlane.f32.xlu0 %v1122_v31 }
 0x233   : > { %v3105_v61 = vpop.eup %2348  ;;  %2368 = vrcp.f32 %v1064_v25  ;;  %1691 = vst [vmem:[%s3083_s9 + $0x48] sm:$0xff] %v1175_v29  ;;  %1690 = vst [vmem:[%s3083_s9 + $0x40] sm:$0xff] %v1174_v40  ;;  %v3496_v25 = vld [vmem:[#allocation11_spill] sm:$0xff] }
 0x234   : > { %v1034_v58 = vmul.f32 1.442695, %v908_v45  ;;  %v1036_v21 = vmul.f32 1.442695, %v909_v33  ;;  %v2351_v22 = vpop.eup %2350  ;;  %v1125_v17 = vadd.f32 %v3105_v61, %v3102_v39 }
 0x235   : > { %v1067_v38 = vpop.xlane.xlu1 %1066  ;;  %v1177_v8 = vmul.f32 %v2351_v22, %v2874_v42  ;;  %v1176_v14 = vmul.f32 %v2351_v22, %v2871_v37 }
 0x236   : > { %2370 = vpow2.f32 %v1034_v58  ;;  %v3113_v2 = vpop.eup %2352  ;;  %1126 = vadd.xlane.f32.xlu1 %v1125_v17 }
 0x237   : > { %2372 = vpow2.f32 %v1036_v21  ;;  %v3115_v63 = vpop.eup %2354  ;;  %v1235_v59 = vpack.c.bf16 %v1177_v8, %v1175_v29  ;;  %1693 = vst [vmem:[%s3083_s9 + $0x58] sm:$0xff] %v1177_v8  ;;  %v1234_v0 = vpack.c.bf16 %v1176_v14, %v1174_v40  ;;  %1692 = vst [vmem:[%s3083_s9 + $0x50] sm:$0xff] %v1176_v14 }
 0x238   : > { %2374 = vrcp.f32 %v1067_v38  ;;  %v2357_v23 = vpop.eup %2356  ;;  %v1070_v24 = vpop.xlane.xlu0 %1069  ;;  %v1038_v42 = vadd.f32 %v3115_v63, %v3113_v2 }
 0x239   : > { %1438 = vmatprep.mubr.bf16.mxu1 %v1235_v59  ;;  %2376 = vrcp.f32 %v1070_v24  ;;  %v1179_v37 = vmul.f32 %v2357_v23, %v2887_v34  ;;  %v1178_v36 = vmul.f32 %v2357_v23, %v2885_v32 }
 0x23a   : > { %v3123_v41 = vpop.eup %2358  ;;  %1439 = vmatmul.mubr.bf16.gmra.mxu1 %v1234_v0  ;;  %1039 = vadd.xlane.f32.xlu0 %v1038_v42 }
 0x23b   : > { %v3125_v57 = vpop.eup %2360  ;;  %1695 = vst [vmem:[%s3083_s9 + $0x68] sm:$0xff] %v1179_v37  ;;  %1694 = vst [vmem:[%s3083_s9 + $0x60] sm:$0xff] %v1178_v36 }
 0x23c   : > { %v2363_v26 = vpop.eup %2362  ;;  %v1073_v48 = vpop.xlane.xlu1 %1072  ;;  %v1041_v62 = vadd.f32 %v3125_v57, %v3123_v41 }
 0x23d   : > { %2378 = vrcp.f32 %v1073_v48  ;;  %v1181_v34 = vmul.f32 %v2363_v26, %v2901_v46  ;;  %v1180_v32 = vmul.f32 %v2363_v26, %v3496_v25 }
 0x23e   : > { %v3133_v20 = vpop.eup %2364  ;;  %1042 = vadd.xlane.f32.xlu1 %v1041_v62 }
 0x23f   : > { %v3135_v31 = vpop.eup %2366  ;;  %v1237_v45 = vpack.c.bf16 %v1181_v34, %v1179_v37  ;;  %1697 = vst [vmem:[%s3083_s9 + $0x78] sm:$0xff] %v1181_v34  ;;  %v1236_v33 = vpack.c.bf16 %v1180_v32, %v1178_v36  ;;  %1696 = vst [vmem:[%s3083_s9 + $0x70] sm:$0xff] %v1180_v32 }
 0x240   : > { %v2369_v29 = vpop.eup %2368  ;;  %v1076_v40 = vpop.xlane.xlu0 %1075  ;;  %v1128_v58 = vadd.f32 %v3135_v31, %v3133_v20 }
 0x241   : > { %1446 = vmatprep.mubr.bf16.mxu1 %v1237_v45  ;;  %2380 = vrcp.f32 %v1076_v40  ;;  %v1183_v46 = vmul.f32 %v2369_v29, %v2914_v50  ;;  %v1182_v21 = vmul.f32 %v2369_v29, %v2912_v49 }
 0x242   : > { %1447 = vmatmul.mubr.bf16.gmra.mxu1 %v1236_v33  ;;  %1129 = vadd.xlane.f32.xlu0 %v1128_v58 }
 0x243   : > { %v3143_v22 = vpop.eup %2370  ;;  %1699 = vst [vmem:[%s3083_s9 + $0x88] sm:$0xff] %v1183_v46  ;;  %1698 = vst [vmem:[%s3083_s9 + $0x80] sm:$0xff] %v1182_v21 }
 0x244   : > { %v3145_v38 = vpop.eup %2372  ;;  %v1079_v8 = vpop.xlane.xlu1 %1078 }
 0x245   : > { %v2375_v17 = vpop.eup %2374  ;;  %v1131_v14 = vadd.f32 %v3145_v38, %v3143_v22  ;;  %2382 = vrcp.f32 %v1079_v8 }
 0x246   : > { %v1185_v49 = vmul.f32 %v2375_v17, %v2926_v52  ;;  %v1184_v50 = vmul.f32 %v2375_v17, %v2924_v35  ;;  %v2377_v59 = vpop.eup %2376 }
 0x247   : > { %1132 = vadd.xlane.f32.xlu1 %v1131_v14  ;;  %v1187_v24 = vmul.f32 %v2377_v59, %v2936_v47  ;;  %v1186_v42 = vmul.f32 %v2377_v59, %v2934_v28 }
 0x248   : > { %v1239_v0 = vpack.c.bf16 %v1185_v49, %v1183_v46  ;;  %1701 = vst [vmem:[%s3083_s9 + $0x98] sm:$0xff] %v1185_v49  ;;  %v1238_v23 = vpack.c.bf16 %v1184_v50, %v1182_v21  ;;  %1700 = vst [vmem:[%s3083_s9 + $0x90] sm:$0xff] %v1184_v50  ;;  %v1082_v37 = vpop.xlane.xlu0 %1081 }
 0x249   : > { %2384 = vrcp.f32 %v1082_v37  ;;  %1703 = vst [vmem:[%s3083_s9 + $0xa8] sm:$0xff] %v1187_v24  ;;  %1702 = vst [vmem:[%s3083_s9 + $0xa0] sm:$0xff] %v1186_v42 }
 0x24a   : > { %1454 = vmatprep.mubr.bf16.mxu1 %v1239_v0  ;;  %v2379_v52 = vpop.eup %2378 }
 0x24b   : > { %1455 = vmatmul.mubr.bf16.gmra.mxu1 %v1238_v23  ;;  %v1189_v35 = vmul.f32 %v2379_v52, %v2946_v60  ;;  %v1188_v36 = vmul.f32 %v2379_v52, %v2944_v43 }
 0x24c   : > { %v1085_v26 = vpop.xlane.xlu1 %1084 }
 0x24d   : > { %2386 = vrcp.f32 %v1085_v26  ;;  %v1241_v48 = vpack.c.bf16 %v1189_v35, %v1187_v24  ;;  %1705 = vst [vmem:[%s3083_s9 + $0xb8] sm:$0xff] %v1189_v35  ;;  %1704 = vst [vmem:[%s3083_s9 + $0xb0] sm:$0xff] %v1188_v36  ;;  %v1240_v28 = vpack.c.bf16 %v1188_v36, %v1186_v42  ;;  %v3497_v36 = vld [vmem:[#allocation13_spill] sm:$0xff] }
 0x24e   : > { %v2381_v47 = vpop.eup %2380 }
 0x24f   : > { %1462 = vmatprep.mubr.bf16.mxu1 %v1241_v48  ;;  %v1191_v62 = vmul.f32 %v2381_v47, %v2954_v56  ;;  %v1190_v34 = vmul.f32 %v2381_v47, %v2952_v55  ;;  %v3498_v48 = vld [vmem:[#allocation12_spill] sm:$0xff] }
 0x250   : > { %v1088_v25 = vpop.xlane.xlu0 %1087 }
 0x251   : > { %2388 = vrcp.f32 %v1088_v25  ;;  %1707 = vst [vmem:[%s3083_s9 + $0xc8] sm:$0xff] %v1191_v62  ;;  %1706 = vst [vmem:[%s3083_s9 + $0xc0] sm:$0xff] %v1190_v34 }
 0x252   : > { %v2383_v60 = vpop.eup %2382 }
 0x253   : > { %1463 = vmatmul.mubr.bf16.gmra.mxu1 %v1240_v28  ;;  %v1193_v43 = vmul.f32 %v2383_v60, %v2962_v4  ;;  %v1192_v32 = vmul.f32 %v2383_v60, %v2960_v3 }
 0x254   : > { %v1091_v45 = vpop.xlane.xlu1 %1090 }
 0x255   : > { %2390 = vrcp.f32 %v1091_v45  ;;  %v1243_v33 = vpack.c.bf16 %v1193_v43, %v1191_v62  ;;  %1709 = vst [vmem:[%s3083_s9 + $0xd8] sm:$0xff] %v1193_v43  ;;  %1708 = vst [vmem:[%s3083_s9 + $0xd0] sm:$0xff] %v1192_v32  ;;  %v1242_v55 = vpack.c.bf16 %v1192_v32, %v1190_v34  ;;  %v3500_v34 = vld [vmem:[#allocation6_spill] sm:$0xff] }
 0x256   : > { %v2385_v56 = vpop.eup %2384 }
 0x257   : > { %1470 = vmatprep.mubr.bf16.mxu1 %v1243_v33  ;;  %v1195_v29 = vmul.f32 %v2385_v56, %v2970_v7  ;;  %v1194_v40 = vmul.f32 %v2385_v56, %v2968_v6 }
 0x258   : > { %v1094_v58 = vpop.xlane.xlu0 %1093 }
 0x259   : > { %2392 = vrcp.f32 %v1094_v58  ;;  %1711 = vst [vmem:[%s3083_s9 + $0xe8] sm:$0xff] %v1195_v29  ;;  %1710 = vst [vmem:[%s3083_s9 + $0xe0] sm:$0xff] %v1194_v40 }
 0x25a   : > { %v2387_v4 = vpop.eup %2386 }
 0x25b   : > { %1471 = vmatmul.mubr.bf16.gmra.mxu1 %v1242_v55  ;;  %v1197_v3 = vmul.f32 %v2387_v4, %v2978_v10  ;;  %v1196_v46 = vmul.f32 %v2387_v4, %v2976_v9 }
 0x25c   : > { %v1097_v21 = vpop.xlane.xlu1 %1096 }
 0x25d   : > { %2394 = vrcp.f32 %v1097_v21  ;;  %v1245_v17 = vpack.c.bf16 %v1197_v3, %v1195_v29  ;;  %1713 = vst [vmem:[%s3083_s9 + $0xf8] sm:$0xff] %v1197_v3  ;;  %1712 = vst [vmem:[%s3083_s9 + $0xf0] sm:$0xff] %v1196_v46  ;;  %v1244_v6 = vpack.c.bf16 %v1196_v46, %v1194_v40  ;;  %v3501_v46 = vld [vmem:[#allocation8_spill] sm:$0xff] }
 0x25e   : > { %v2389_v7 = vpop.eup %2388 }
 0x25f   : > { %1478 = vmatprep.mubr.bf16.mxu1 %v1245_v17  ;;  %v1199_v8 = vmul.f32 %v2389_v7, %v2986_v13  ;;  %v1198_v14 = vmul.f32 %v2389_v7, %v2984_v12  ;;  %v3502_v17 = vld [vmem:[#allocation7_spill] sm:$0xff] }
 0x260   : > { %v1100_v49 = vpop.xlane.xlu0 %1099 }
 0x261   : > { %2396 = vrcp.f32 %v1100_v49  ;;  %1715 = vst [vmem:[%s3083_s9 + $0x108] sm:$0xff] %v1199_v8  ;;  %1714 = vst [vmem:[%s3083_s9 + $0x100] sm:$0xff] %v1198_v14 }
 0x262   : > { %v2391_v10 = vpop.eup %2390 }
 0x263   : > { %1479 = vmatmul.mubr.bf16.gmra.mxu1 %v1244_v6  ;;  %v1201_v9 = vmul.f32 %v2391_v10, %v2994_v16  ;;  %v1200_v50 = vmul.f32 %v2391_v10, %v2992_v15 }
 0x264   : > { %v1103_v59 = vpop.xlane.xlu1 %1102 }
 0x265   : > { %2398 = vrcp.f32 %v1103_v59  ;;  %v1247_v0 = vpack.c.bf16 %v1201_v9, %v1199_v8  ;;  %1717 = vst [vmem:[%s3083_s9 + $0x118] sm:$0xff] %v1201_v9  ;;  %1716 = vst [vmem:[%s3083_s9 + $0x110] sm:$0xff] %v1200_v50  ;;  %v1246_v12 = vpack.c.bf16 %v1200_v50, %v1198_v14  ;;  %v3504_v8 = vld [vmem:[#allocation9_spill] sm:$0xff]  ;;  %v3505_v50 = vld [vmem:[#allocation16_spill] sm:$0xff] }
 0x266   : > { %v2393_v13 = vpop.eup %2392 }
 0x267   : > { %1486 = vmatprep.mubr.bf16.mxu1 %v1247_v0  ;;  %v1203_v23 = vmul.f32 %v2393_v13, %v3002_v19  ;;  %v1202_v24 = vmul.f32 %v2393_v13, %v3000_v18  ;;  %v3506_v0 = vld [vmem:[#allocation15_spill] sm:$0xff] }
 0x268   : > { %v1106_v42 = vpop.xlane.xlu0 %1105 }
 0x269   : > { %2400 = vrcp.f32 %v1106_v42  ;;  %1719 = vst [vmem:[%s3083_s9 + $0x128] sm:$0xff] %v1203_v23  ;;  %1718 = vst [vmem:[%s3083_s9 + $0x120] sm:$0xff] %v1202_v24 }
 0x26a   : > { %v2395_v16 = vpop.eup %2394 }
 0x26b   : > { %1487 = vmatmul.mubr.bf16.gmra.mxu1 %v1246_v12  ;;  %v1205_v15 = vmul.f32 %v2395_v16, %v3010_v30  ;;  %v1204_v37 = vmul.f32 %v2395_v16, %v3008_v27  ;;  %v3499_v27 = vld [vmem:[#allocation14_spill] sm:$0xff] }
 0x26c   : > { %v1109_v52 = vpop.xlane.xlu1 %1108 }
 0x26d   : > { %2402 = vrcp.f32 %v1109_v52  ;;  %v1249_v35 = vpack.c.bf16 %v1205_v15, %v1203_v23  ;;  %1721 = vst [vmem:[%s3083_s9 + $0x138] sm:$0xff] %v1205_v15  ;;  %1720 = vst [vmem:[%s3083_s9 + $0x130] sm:$0xff] %v1204_v37  ;;  %v1248_v18 = vpack.c.bf16 %v1204_v37, %v1202_v24  ;;  %v3507_v24 = vld [vmem:[#allocation17_spill] sm:$0xff] }
 0x26e   : > { %v2397_v19 = vpop.eup %2396 }
 0x26f   : > { %1494 = vmatprep.mubr.bf16.mxu1 %v1249_v35  ;;  %v1207_v26 = vmul.f32 %v2397_v19, %v3497_v36  ;;  %v1206_v47 = vmul.f32 %v2397_v19, %v3498_v48 }
 0x270   : > { %v1112_v28 = vpop.xlane.xlu0 %1111 }
 0x271   : > { %2404 = vrcp.f32 %v1112_v28  ;;  %1723 = vst [vmem:[%s3083_s9 + $0x148] sm:$0xff] %v1207_v26  ;;  %1722 = vst [vmem:[%s3083_s9 + $0x140] sm:$0xff] %v1206_v47 }
 0x272   : > { %v2399_v30 = vpop.eup %2398 }
 0x273   : > { %1495 = vmatmul.mubr.bf16.gmra.mxu1 %v1248_v18  ;;  %v1209_v62 = vmul.f32 %v2399_v30, %v3499_v27  ;;  %v1208_v25 = vmul.f32 %v2399_v30, %v3500_v34 }
 0x274   : > { %v1115_v60 = vpop.xlane.xlu1 %1114 }
 0x275   : > { %2406 = vrcp.f32 %v1115_v60  ;;  %v1251_v43 = vpack.c.bf16 %v1209_v62, %v1207_v26  ;;  %1725 = vst [vmem:[%s3083_s9 + $0x158] sm:$0xff] %v1209_v62  ;;  %1724 = vst [vmem:[%s3083_s9 + $0x150] sm:$0xff] %v1208_v25  ;;  %v1250_v45 = vpack.c.bf16 %v1208_v25, %v1206_v47 }
 0x276   : > { %v2401_v32 = vpop.eup %2400 }
 0x277   : > { %1502 = vmatprep.mubr.bf16.mxu1 %v1251_v43  ;;  %v1211_v33 = vmul.f32 %v2401_v32, %v3034_v53  ;;  %v1210_v56 = vmul.f32 %v2401_v32, %v3032_v54 }
 0x278   : > { %v1118_v55 = vpop.xlane.xlu0 %1117 }
 0x279   : > { %2408 = vrcp.f32 %v1118_v55  ;;  %1727 = vst [vmem:[%s3083_s9 + $0x168] sm:$0xff] %v1211_v33  ;;  %1726 = vst [vmem:[%s3083_s9 + $0x160] sm:$0xff] %v1210_v56 }
 0x27a   : > { %v2403_v29 = vpop.eup %2402 }
 0x27b   : > { %1503 = vmatmul.mubr.bf16.gmra.mxu1 %v1250_v45  ;;  %v1213_v40 = vmul.f32 %v2403_v29, %v3042_v5  ;;  %v1212_v58 = vmul.f32 %v2403_v29, %v3040_v1  ;;  %v3503_v1 = vld [vmem:[#allocation10_spill] sm:$0xff] }
 0x27c   : > { %v1121_v4 = vpop.xlane.xlu1 %1120 }
 0x27d   : > { %2410 = vrcp.f32 %v1121_v4  ;;  %v1253_v3 = vpack.c.bf16 %v1213_v40, %v1211_v33  ;;  %1729 = vst [vmem:[%s3083_s9 + $0x178] sm:$0xff] %v1213_v40  ;;  %1728 = vst [vmem:[%s3083_s9 + $0x170] sm:$0xff] %v1212_v58  ;;  %v1252_v53 = vpack.c.bf16 %v1212_v58, %v1210_v56 }
 0x27e   : > { %v2405_v54 = vpop.eup %2404 }
 0x27f   : > { %1510 = vmatprep.mubr.bf16.mxu1 %v1253_v3  ;;  %v1215_v21 = vmul.f32 %v2405_v54, %v3501_v46  ;;  %v1214_v7 = vmul.f32 %v2405_v54, %v3502_v17  ;;  %v1588_v54 = vld [vmem:[%s3255_s17 + $0x18] sm:$0xff] }
 0x281   : > { %1731 = vst [vmem:[%s3083_s9 + $0x188] sm:$0xff] %v1215_v21  ;;  %1730 = vst [vmem:[%s3083_s9 + $0x180] sm:$0xff] %v1214_v7 }
 0x282   : > { %v2407_v5 = vpop.eup %2406 }
 0x283   : > { %1511 = vmatmul.mubr.bf16.gmra.mxu1 %v1252_v53  ;;  %v1217_v6 = vmul.f32 %v2407_v5, %v3503_v1  ;;  %v1216_v14 = vmul.f32 %v2407_v5, %v3504_v8  ;;  %v1589_v5 = vld [vmem:[%s3255_s17 + $0x20] sm:$0xff] }
 0x285   : > { %v1255_v49 = vpack.c.bf16 %v1217_v6, %v1215_v21  ;;  %1733 = vst [vmem:[%s3083_s9 + $0x198] sm:$0xff] %v1217_v6  ;;  %1732 = vst [vmem:[%s3083_s9 + $0x190] sm:$0xff] %v1216_v14  ;;  %v1254_v9 = vpack.c.bf16 %v1216_v14, %v1214_v7 }
 0x286   : > { %v2409_v10 = vpop.eup %2408 }
 0x287   : > { %1518 = vmatprep.mubr.bf16.mxu1 %v1255_v49  ;;  %v1219_v59 = vmul.f32 %v2409_v10, %v3505_v50  ;;  %v1218_v13 = vmul.f32 %v2409_v10, %v3506_v0  ;;  %v1590_v10 = vld [vmem:[%s3255_s17 + $0x28] sm:$0xff] }
 0x289   : > { %1735 = vst [vmem:[%s3083_s9 + $0x1a8] sm:$0xff] %v1219_v59  ;;  %1734 = vst [vmem:[%s3083_s9 + $0x1a0] sm:$0xff] %v1218_v13 }
 0x28a   : > { %v2411_v12 = vpop.eup %2410 }
 0x28b   : > { %1519 = vmatmul.mubr.bf16.gmra.mxu1 %v1254_v9  ;;  %v1221_v23 = vmul.f32 %v2411_v12, %v3066_v11  ;;  %v1220_v42 = vmul.f32 %v2411_v12, %v3507_v24  ;;  %v1591_v12 = vld [vmem:[%s3255_s17 + $0x30] sm:$0xff] }
 0x28d   : > { %v1257_v16 = vpack.c.bf16 %v1221_v23, %v1219_v59  ;;  %1737 = vst [vmem:[%s3083_s9 + $0x1b8] sm:$0xff] %v1221_v23  ;;  %1736 = vst [vmem:[%s3083_s9 + $0x1b0] sm:$0xff] %v1220_v42  ;;  %v1256_v15 = vpack.c.bf16 %v1220_v42, %v1218_v13 }
 0x28f   : > { %1526 = vmatprep.mubr.bf16.mxu1 %v1257_v16 }
 0x293   : > { %1527 = vmatmul.mubr.bf16.gmra.mxu1 %v1256_v15 }
 0x2bb   : > { %v1124_v37 = vpop.xlane.xlu0 %1123 }
 0x2bc   : > { %2412 = vrcp.f32 %v1124_v37  ;;  %v1592_v37 = vld [vmem:[%s3255_s17 + $0x38] sm:$0xff] }
 0x2bf   : > { %v1127_v52 = vpop.xlane.xlu1 %1126 }
 0x2c0   : > { %2414 = vrcp.f32 %v1127_v52 }
 0x2c3   : > { %v1040_v35 = vpop.xlane.xlu0 %1039 }
 0x2c4   : > { %2416 = vrcp.f32 %v1040_v35 }
 0x2c7   : > { %v1043_v19 = vpop.xlane.xlu1 %1042 }
 0x2c8   : > { %2418 = vrcp.f32 %v1043_v19 }
 0x2c9   : > { %v2413_v11 = vpop.eup %2412 }
 0x2ca   : > { %v1223_v18 = vmul.f32 %v2413_v11, %v3095_v44  ;;  %v1222_v36 = vmul.f32 %v2413_v11, %v3092_v51 }
 0x2cb   : > { %v1130_v26 = vpop.xlane.xlu0 %1129 }
 0x2cc   : > { %2420 = vrcp.f32 %v1130_v26  ;;  %1739 = vst [vmem:[%s3083_s9 + $0x1c8] sm:$0xff] %v1223_v18  ;;  %1738 = vst [vmem:[%s3083_s9 + $0x1c0] sm:$0xff] %v1222_v36 }
 0x2cd   : > { %v2415_v48 = vpop.eup %2414 }
 0x2ce   : > { %v1225_v47 = vmul.f32 %v2415_v48, %v3105_v61  ;;  %v1224_v28 = vmul.f32 %v2415_v48, %v3102_v39 }
 0x2d0   : > { %v1133_v30 = vpop.xlane.xlu1 %1132  ;;  %v1259_v27 = vpack.c.bf16 %v1225_v47, %v1223_v18  ;;  %1741 = vst [vmem:[%s3083_s9 + $0x1d8] sm:$0xff] %v1225_v47  ;;  %v1258_v44 = vpack.c.bf16 %v1224_v28, %v1222_v36  ;;  %1740 = vst [vmem:[%s3083_s9 + $0x1d0] sm:$0xff] %v1224_v28  ;;  %v1593_v36 = vld [vmem:[%s3255_s17 + $0x40] sm:$0xff] }
 0x2d1   : > { %2422 = vrcp.f32 %v1133_v30  ;;  %v2417_v51 = vpop.eup %2416 }
 0x2d2   : > { %1534 = vmatprep.mubr.bf16.mxu1 %v1259_v27  ;;  %v1167_v62 = vmul.f32 %v2417_v51, %v3115_v63  ;;  %v1166_v34 = vmul.f32 %v2417_v51, %v3113_v2  ;;  %v1594_v27 = vld [vmem:[%s3255_s17 + $0x48] sm:$0xff] }
 0x2d3   : > { %1535 = vmatmul.mubr.bf16.gmra.mxu1 %v1258_v44 }
 0x2d4   : > { %1683 = vst [vmem:[%s3083_s9 + $0x8] sm:$0xff] %v1167_v62  ;;  %1682 = vst [vmem:[%s3083_s9] sm:$0xff] %v1166_v34 }
 0x2d5   : > { %v2419_v39 = vpop.eup %2418 }
 0x2d6   : > { %v1169_v61 = vmul.f32 %v2419_v39, %v3125_v57  ;;  %v1168_v25 = vmul.f32 %v2419_v39, %v3123_v41 }
 0x2d8   : > { %v1231_v60 = vpack.c.bf16 %v1169_v61, %v1167_v62  ;;  %1685 = vst [vmem:[%s3083_s9 + $0x18] sm:$0xff] %v1169_v61  ;;  %v1230_v43 = vpack.c.bf16 %v1168_v25, %v1166_v34  ;;  %1684 = vst [vmem:[%s3083_s9 + $0x10] sm:$0xff] %v1168_v25  ;;  %v1595_v61 = vld [vmem:[%s3255_s17 + $0x50] sm:$0xff] }
 0x2d9   : > { %v2421_v32 = vpop.eup %2420 }
 0x2da   : > { %1422 = vmatprep.mubr.bf16.mxu0 %v1231_v60  ;;  %v1227_v2 = vmul.f32 %v2421_v32, %v3135_v31  ;;  %v1226_v63 = vmul.f32 %v2421_v32, %v3133_v20  ;;  %v3257_v31 = vstv %s1551_s13  ;;  %s2424_s13 = scalar_lea.vmem %s3330_s7, 8192 }
 0x2db   : > { %1423 = vmatmul.mubr.bf16.vlgmr.msra.gmra.mxu0 %v1230_v43  ;;  %p2425_p12 = scmp.ne.s32.totalorder %s3330_s7, %s2424_s13 }
 0x2dc   : > { %1743 = vst [vmem:[%s3083_s9 + $0x1e8] sm:$0xff] %v1227_v2  ;;  %1742 = vst [vmem:[%s3083_s9 + $0x1e0] sm:$0xff] %v1226_v63 }
 0x2dd   : > { %p2426_p13 = pnand %p2425_p12, %p2584_p4 }
 0x2de   : > { %v2423_v45 = vpop.eup %2422 }
 0x2df   : > { %v1229_v57 = vmul.f32 %v2423_v45, %v3145_v38  ;;  %v1228_v41 = vmul.f32 %v2423_v45, %v3143_v22  ;;  %v1587_v38 = vld [vmem:[%s3255_s17 + $0x10] sm:$0xff]  ;;  %p2427_p0 = pneg %p2426_p13 }
 0x2e1   : > { %v1261_v33 = vpack.c.bf16 %v1229_v57, %v1227_v2  ;;  %1745 = vst [vmem:[%s3083_s9 + $0x1f8] sm:$0xff] %v1229_v57  ;;  %v1260_v56 = vpack.c.bf16 %v1228_v41, %v1226_v63  ;;  %1744 = vst [vmem:[%s3083_s9 + $0x1f0] sm:$0xff] %v1228_v41  ;;  %v1596_v63 = vld [vmem:[%s3255_s17 + $0x58] sm:$0xff]  ;;  %s2503_s9 = smov [#allocation3]  }
 0x2e2   : > { %s2428_s14 = sshll.u32 %s2503_s9, 4  ;;  %s2429_s14 = int_to_ptr.vmem [resolvable:$false] %s2428_s14 }
 0x2e3   : > { %1542 = vmatprep.mubr.bf16.mxu1 %v1261_v33  ;;  %s2430_s15 = scalar_lea.vmem %s2429_s14, 16384  ;;  %p2431_p1 = scmp.lt.s32.totalorder %s3330_s7, %s2429_s14 }
 0x2e4   : > { %1543 = vmatmul.mubr.bf16.gmra.mxu1 %v1260_v56  ;;  %p2432_p2 = scmp.lt.s32.totalorder %s2430_s15, %s2424_s13 }
 0x2e6   : > { %p2433_p3 = por %p2432_p2, %p2431_p1 }
 0x2e8   : > { %p2434_p5 = pnand %p2433_p3, %p2427_p0 }
 0x2f0   : > { %v2034_v55 = vpop.f32.mrf.mxu1 }
 0x2f2   : > { %v2035_v20 = vpop.f32.mrf.mxu1 }
 0x2f3   : > { %v2036_v22 = vadd.f32 %v2035_v20, %v2034_v55  ;;  %v1597_v55 = vld [vmem:[%s3255_s17 + $0x60] sm:$0xff] }
 0x2f4   : > { %v2037_v29 = vpop.f32.mrf.mxu1 }
 0x2f5   : > { %v1555_v40 = vmul.f32 %v2036_v22, %v3257_v31 }
 0x2f6   : > { %v2038_v58 = vpop.f32.mrf.mxu1 }
 0x2f7   : > { %v1619_v4 = vadd.f32 %v1587_v38, %v1555_v40  ;;  %v2039_v3 = vadd.f32 %v2038_v58, %v2037_v29  ;;  %v1598_v58 = vld [vmem:[%s3255_s17 + $0x68] sm:$0xff] }
 0x2f9   : > { %1652 = vst.msk [vmem:[%s3264_s12 + $0x10] sm:$0xff] %vm1649_vm2, %v1619_v4  ;;  %v1556_v53 = vmul.f32 %v2039_v3, %v3257_v31 }
 0x2fa   : > { %v2040_v46 = vpop.f32.mrf.mxu1 }
 0x2fb   : > { %v1620_v21 = vadd.f32 %v1588_v54, %v1556_v53 }
 0x2fc   : > { %v2041_v17 = vpop.f32.mrf.mxu1 }
 0x2fd   : > { %1653 = vst.msk [vmem:[%s3264_s12 + $0x18] sm:$0xff] %vm1649_vm2, %v1620_v21  ;;  %v2042_v7 = vadd.f32 %v2041_v17, %v2040_v46  ;;  %v1599_v21 = vld [vmem:[%s3255_s17 + $0x70] sm:$0xff] }
 0x2fe   : > { %v2043_v1 = vpop.f32.mrf.mxu1 }
 0x2ff   : > { %v1557_v6 = vmul.f32 %v2042_v7, %v3257_v31 }
 0x300   : > { %v2044_v8 = vpop.f32.mrf.mxu1 }
 0x301   : > { %v1621_v14 = vadd.f32 %v1589_v5, %v1557_v6  ;;  %v2045_v49 = vadd.f32 %v2044_v8, %v2043_v1  ;;  %v1600_v8 = vld [vmem:[%s3255_s17 + $0x78] sm:$0xff] }
 0x302   : > { %v2046_v9 = vpop.f32.mrf.mxu1 }
 0x303   : > { %1654 = vst.msk [vmem:[%s3264_s12 + $0x20] sm:$0xff] %vm1649_vm2, %v1621_v14  ;;  %v1558_v50 = vmul.f32 %v2045_v49, %v3257_v31 }
 0x304   : > { %v2047_v59 = vpop.f32.mrf.mxu1 }
 0x305   : > { %v1622_v0 = vadd.f32 %v1590_v10, %v1558_v50  ;;  %v2048_v13 = vadd.f32 %v2047_v59, %v2046_v9  ;;  %v1601_v59 = vld [vmem:[%s3255_s17 + $0x80] sm:$0xff] }
 0x306   : > { %v2049_v23 = vpop.f32.mrf.mxu1 }
 0x307   : > { %1655 = vst.msk [vmem:[%s3264_s12 + $0x28] sm:$0xff] %vm1649_vm2, %v1622_v0  ;;  %v1559_v24 = vmul.f32 %v2048_v13, %v3257_v31 }
 0x308   : > { %v2050_v42 = vpop.f32.mrf.mxu1 }
 0x309   : > { %v1623_v16 = vadd.f32 %v1591_v12, %v1559_v24  ;;  %v2051_v15 = vadd.f32 %v2050_v42, %v2049_v23  ;;  %v1602_v42 = vld [vmem:[%s3255_s17 + $0x88] sm:$0xff] }
 0x30b   : > { %v2052_v52 = vpop.f32.mrf.mxu1  ;;  %1656 = vst.msk [vmem:[%s3264_s12 + $0x30] sm:$0xff] %vm1649_vm2, %v1623_v16  ;;  %v1560_v35 = vmul.f32 %v2051_v15, %v3257_v31 }
 0x30d   : > { %v2053_v19 = vpop.f32.mrf.mxu1  ;;  %v1624_v11 = vadd.f32 %v1592_v37, %v1560_v35 }
 0x30e   : > { %v2054_v18 = vadd.f32 %v2053_v19, %v2052_v52 }
 0x30f   : > { %v2055_v26 = vpop.f32.mrf.mxu1  ;;  %1657 = vst.msk [vmem:[%s3264_s12 + $0x38] sm:$0xff] %vm1649_vm2, %v1624_v11 }
 0x310   : > { %v1561_v48 = vmul.f32 %v2054_v18, %v3257_v31 }
 0x311   : > { %v2056_v47 = vpop.f32.mrf.mxu1 }
 0x312   : > { %v1625_v28 = vadd.f32 %v1593_v36, %v1561_v48  ;;  %v2057_v30 = vadd.f32 %v2056_v47, %v2055_v26 }
 0x313   : > { %v2058_v44 = vpop.f32.mrf.mxu1 }
 0x314   : > { %1658 = vst.msk [vmem:[%s3264_s12 + $0x40] sm:$0xff] %vm1649_vm2, %v1625_v28  ;;  %v1562_v51 = vmul.f32 %v2057_v30, %v3257_v31 }
 0x315   : > { %v2059_v62 = vpop.f32.mrf.mxu1 }
 0x316   : > { %v1626_v34 = vadd.f32 %v1594_v27, %v1562_v51  ;;  %v2060_v39 = vadd.f32 %v2059_v62, %v2058_v44 }
 0x317   : > { %v2061_v25 = vpop.f32.mrf.mxu1 }
 0x318   : > { %1659 = vst.msk [vmem:[%s3264_s12 + $0x48] sm:$0xff] %vm1649_vm2, %v1626_v34  ;;  %v1563_v60 = vmul.f32 %v2060_v39, %v3257_v31 }
 0x319   : > { %v2062_v43 = vpop.f32.mrf.mxu1 }
 0x31a   : > { %v1627_v32 = vadd.f32 %v1595_v61, %v1563_v60  ;;  %v2063_v2 = vadd.f32 %v2062_v43, %v2061_v25 }
 0x31b   : > { %v2064_v45 = vpop.f32.mrf.mxu1 }
 0x31c   : > { %1660 = vst.msk [vmem:[%s3264_s12 + $0x50] sm:$0xff] %vm1649_vm2, %v1627_v32  ;;  %v1564_v57 = vmul.f32 %v2063_v2, %v3257_v31 }
 0x31d   : > { %v2065_v41 = vpop.f32.mrf.mxu1 }
 0x31e   : > { %v1628_v33 = vadd.f32 %v1596_v63, %v1564_v57  ;;  %v2066_v56 = vadd.f32 %v2065_v41, %v2064_v45 }
 0x31f   : > { %v2067_v20 = vpop.f32.mrf.mxu1 }
 0x320   : > { %1661 = vst.msk [vmem:[%s3264_s12 + $0x58] sm:$0xff] %vm1649_vm2, %v1628_v33  ;;  %v1565_v22 = vmul.f32 %v2066_v56, %v3257_v31 }
 0x321   : > { %v2068_v38 = vpop.f32.mrf.mxu1 }
 0x322   : > { %v1629_v29 = vadd.f32 %v1597_v55, %v1565_v22  ;;  %v2069_v40 = vadd.f32 %v2068_v38, %v2067_v20 }
 0x323   : > { %v2070_v4 = vpop.f32.mrf.mxu1 }
 0x324   : > { %1662 = vst.msk [vmem:[%s3264_s12 + $0x60] sm:$0xff] %vm1649_vm2, %v1629_v29  ;;  %v1566_v3 = vmul.f32 %v2069_v40, %v3257_v31 }
 0x325   : > { %v2071_v54 = vpop.f32.mrf.mxu1 }
 0x326   : > { %v1630_v53 = vadd.f32 %v1598_v58, %v1566_v3  ;;  %v2072_v46 = vadd.f32 %v2071_v54, %v2070_v4 }
 0x327   : > { %v2073_v17 = vpop.f32.mrf.mxu1 }
 0x328   : > { %1663 = vst.msk [vmem:[%s3264_s12 + $0x68] sm:$0xff] %vm1649_vm2, %v1630_v53  ;;  %v1567_v7 = vmul.f32 %v2072_v46, %v3257_v31 }
 0x329   : > { %v2074_v5 = vpop.f32.mrf.mxu1 }
 0x32a   : > { %v1631_v1 = vadd.f32 %v1599_v21, %v1567_v7  ;;  %v2075_v6 = vadd.f32 %v2074_v5, %v2073_v17 }
 0x32b   : > { %v2076_v14 = vpop.f32.mrf.mxu1 }
 0x32c   : > { %1664 = vst.msk [vmem:[%s3264_s12 + $0x70] sm:$0xff] %vm1649_vm2, %v1631_v1  ;;  %v1568_v49 = vmul.f32 %v2075_v6, %v3257_v31 }
 0x32d   : > { %v2077_v10 = vpop.f32.mrf.mxu1 }
 0x32e   : > { %v1632_v9 = vadd.f32 %v1600_v8, %v1568_v49  ;;  %v2078_v50 = vadd.f32 %v2077_v10, %v2076_v14 }
 0x32f   : > { %v2079_v0 = vpop.f32.mrf.mxu1 }
 0x330   : > { %1665 = vst.msk [vmem:[%s3264_s12 + $0x78] sm:$0xff] %vm1649_vm2, %v1632_v9  ;;  %v1569_v13 = vmul.f32 %v2078_v50, %v3257_v31 }
 0x331   : > { %v2080_v12 = vpop.f32.mrf.mxu1 }
 0x332   : > { %v1633_v23 = vadd.f32 %v1601_v59, %v1569_v13  ;;  %v2081_v24 = vadd.f32 %v2080_v12, %v2079_v0 }
 0x333   : > { %v2082_v16 = vpop.f32.mrf.mxu1 }
 0x334   : > { %1666 = vst.msk [vmem:[%s3264_s12 + $0x80] sm:$0xff] %vm1649_vm2, %v1633_v23  ;;  %v1570_v15 = vmul.f32 %v2081_v24, %v3257_v31 }
 0x335   : > { %v2083_v37 = vpop.f32.mrf.mxu1 }
 0x336   : > { %2437 = shalt.err (!%p2434_p5)
}
 0x337   : > { %s2438_s29 = scalar_lea.hbm %s3326_s0, 8192  ;;  %s2442_s19 = scalar_lea.hbm %s3454_s6, 16384 }
 0x338   : > { %p2439_p6 = scmp.ne.s32.totalorder %s3326_s0, %s2438_s29  ;;  %p2443_p10 = scmp.lt.s32.totalorder %s3326_s0, %s3454_s6 }
 0x339   : > { %p2444_p11 = scmp.lt.s32.totalorder %s2442_s19, %s2438_s29 }
 0x33a   : > { %p2440_p7 = pnand %p2439_p6, %p2584_p4 }
 0x33b   : > { %p2445_p12 = por %p2444_p11, %p2443_p10 }
 0x33c   : > { %p2441_p9 = pneg %p2440_p7 }
 0x33e   : > { %p2446_p13 = pnand %p2445_p12, %p2441_p9 }
 0x340   : > { %2449 = shalt.err (!%p2446_p13)
}
 0x341   : > { %s2504_s22 = smov 256   ;;  %s2505_s13 = smov 16   ;;  %v1634_v52 = vadd.f32 %v1602_v42, %v1570_v15  ;;  %v2084_v35 = vadd.f32 %v2083_v37, %v2082_v16  ;;  %v1603_v19 = vld [vmem:[%s3255_s17 + $0x90] sm:$0xff]  ;;  %v2085_v11 = vpop.f32.mrf.mxu1  ;;  %v1604_v47 = vld [vmem:[%s3255_s17 + $0x98] sm:$0xff]  ;;  %v1605_v62 = vld [vmem:[%s3255_s17 + $0xa0] sm:$0xff] }
 0x342   : > { %2140 = dma.vmem_to_hbm [thread:$0]  (%p2584_p4), %s3330_s7, 8192, %s3326_s0, %s3337_s26, %s2504_s22, %s2504_s22, %s2505_s13  }
 0x343   : > { %1667 = vst.msk [vmem:[%s3264_s12 + $0x88] sm:$0xff] %vm1649_vm2, %v1634_v52  ;;  %v1571_v18 = vmul.f32 %v2084_v35, %v3257_v31  ;;  %v2086_v36 = vpop.f32.mrf.mxu1  ;;  %v1606_v43 = vld [vmem:[%s3255_s17 + $0xa8] sm:$0xff]  ;;  %v1607_v41 = vld [vmem:[%s3255_s17 + $0xb0] sm:$0xff]  ;;  %v1608_v38 = vld [vmem:[%s3255_s17 + $0xb8] sm:$0xff] }
 0x344   : > { %v2087_v48 = vadd.f32 %v2086_v36, %v2085_v11  ;;  %v1609_v54 = vld [vmem:[%s3255_s17 + $0xc0] sm:$0xff]  ;;  %v1610_v5 = vld [vmem:[%s3255_s17 + $0xc8] sm:$0xff]  ;;  %v1611_v10 = vld [vmem:[%s3255_s17 + $0xd0] sm:$0xff] }
 0x345   : > { %v1635_v26 = vadd.f32 %v1603_v19, %v1571_v18  ;;  %v2088_v28 = vpop.f32.mrf.mxu1  ;;  %v1612_v12 = vld [vmem:[%s3255_s17 + $0xd8] sm:$0xff]  ;;  %v1613_v37 = vld [vmem:[%s3255_s17 + $0xe0] sm:$0xff]  ;;  %v1614_v36 = vld [vmem:[%s3255_s17 + $0xe8] sm:$0xff] }
 0x346   : > { %v1572_v30 = vmul.f32 %v2087_v48, %v3257_v31 }
 0x347   : > { %1668 = vst.msk [vmem:[%s3264_s12 + $0x90] sm:$0xff] %vm1649_vm2, %v1635_v26  ;;  %v2089_v27 = vpop.f32.mrf.mxu1 }
 0x348   : > { %v1636_v44 = vadd.f32 %v1604_v47, %v1572_v30  ;;  %v2090_v51 = vadd.f32 %v2089_v27, %v2088_v28  ;;  %v1585_v27 = vld [vmem:[%s3255_s17] sm:$0xff] }
 0x349   : > { %v2091_v34 = vpop.f32.mrf.mxu1 }
 0x34a   : > { %1669 = vst.msk [vmem:[%s3264_s12 + $0x98] sm:$0xff] %vm1649_vm2, %v1636_v44  ;;  %v1573_v39 = vmul.f32 %v2090_v51, %v3257_v31 }
 0x34b   : > { %v2092_v61 = vpop.f32.mrf.mxu1 }
 0x34c   : > { %v1637_v25 = vadd.f32 %v1605_v62, %v1573_v39  ;;  %v2093_v60 = vadd.f32 %v2092_v61, %v2091_v34  ;;  %v1586_v61 = vld [vmem:[%s3255_s17 + $0x8] sm:$0xff] }
 0x34d   : > { %v2094_v32 = vpop.f32.mrf.mxu1 }
 0x34e   : > { %1670 = vst.msk [vmem:[%s3264_s12 + $0xa0] sm:$0xff] %vm1649_vm2, %v1637_v25  ;;  %v1574_v2 = vmul.f32 %v2093_v60, %v3257_v31 }
 0x34f   : > { %v2095_v63 = vpop.f32.mrf.mxu1 }
 0x350   : > { %v1638_v45 = vadd.f32 %v1606_v43, %v1574_v2  ;;  %v2096_v57 = vadd.f32 %v2095_v63, %v2094_v32  ;;  %v1615_v63 = vld [vmem:[%s3255_s17 + $0xf0] sm:$0xff] }
 0x351   : > { %v2097_v33 = vpop.f32.mrf.mxu1 }
 0x352   : > { %1671 = vst.msk [vmem:[%s3264_s12 + $0xa8] sm:$0xff] %vm1649_vm2, %v1638_v45  ;;  %v1575_v56 = vmul.f32 %v2096_v57, %v3257_v31 }
 0x353   : > { %v2098_v55 = vpop.f32.mrf.mxu1 }
 0x354   : > { %v1639_v20 = vadd.f32 %v1607_v41, %v1575_v56  ;;  %v2099_v22 = vadd.f32 %v2098_v55, %v2097_v33  ;;  %v1616_v55 = vld [vmem:[%s3255_s17 + $0xf8] sm:$0xff] }
 0x355   : > { %v2100_v29 = vpop.f32.mrf.mxu1 }
 0x356   : > { %1672 = vst.msk [vmem:[%s3264_s12 + $0xb0] sm:$0xff] %vm1649_vm2, %v1639_v20  ;;  %v1576_v40 = vmul.f32 %v2099_v22, %v3257_v31 }
 0x357   : > { %v2101_v58 = vpop.f32.mrf.mxu1 }
 0x358   : > { %v1640_v4 = vadd.f32 %v1608_v38, %v1576_v40  ;;  %v2102_v3 = vadd.f32 %v2101_v58, %v2100_v29 }
 0x359   : > { %v2103_v53 = vpop.f32.mrf.mxu1 }
 0x35a   : > { %1673 = vst.msk [vmem:[%s3264_s12 + $0xb8] sm:$0xff] %vm1649_vm2, %v1640_v4  ;;  %v1577_v46 = vmul.f32 %v2102_v3, %v3257_v31 }
 0x35b   : > { %v2104_v21 = vpop.f32.mrf.mxu1 }
 0x35c   : > { %v1641_v17 = vadd.f32 %v1609_v54, %v1577_v46  ;;  %v2105_v7 = vadd.f32 %v2104_v21, %v2103_v53 }
 0x35d   : > { %v2106_v1 = vpop.f32.mrf.mxu1 }
 0x35e   : > { %1674 = vst.msk [vmem:[%s3264_s12 + $0xc0] sm:$0xff] %vm1649_vm2, %v1641_v17  ;;  %v1578_v6 = vmul.f32 %v2105_v7, %v3257_v31 }
 0x35f   : > { %v2107_v8 = vpop.f32.mrf.mxu1 }
 0x360   : > { %v1642_v14 = vadd.f32 %v1610_v5, %v1578_v6  ;;  %v2108_v49 = vadd.f32 %v2107_v8, %v2106_v1 }
 0x361   : > { %v2109_v9 = vpop.f32.mrf.mxu1 }
 0x362   : > { %1675 = vst.msk [vmem:[%s3264_s12 + $0xc8] sm:$0xff] %vm1649_vm2, %v1642_v14  ;;  %v1579_v50 = vmul.f32 %v2108_v49, %v3257_v31 }
 0x363   : > { %v2110_v59 = vpop.f32.mrf.mxu1 }
 0x364   : > { %v1643_v0 = vadd.f32 %v1611_v10, %v1579_v50  ;;  %v2111_v13 = vadd.f32 %v2110_v59, %v2109_v9 }
 0x366   : > { %1676 = vst.msk [vmem:[%s3264_s12 + $0xd0] sm:$0xff] %vm1649_vm2, %v1643_v0  ;;  %v1580_v23 = vmul.f32 %v2111_v13, %v3257_v31 }
 0x368   : > { %v1644_v24 = vadd.f32 %v1612_v12, %v1580_v23 }
 0x36a   : > { %1677 = vst.msk [vmem:[%s3264_s12 + $0xd8] sm:$0xff] %vm1649_vm2, %v1644_v24 }
 0x393   : > { %v2112_v42 = vpop.f32.mrf.mxu1 }
 0x395   : > { %v2113_v16 = vpop.f32.mrf.mxu1 }
 0x396   : > { %v2114_v15 = vadd.f32 %v2113_v16, %v2112_v42 }
 0x397   : > { %v2115_v52 = vpop.f32.mrf.mxu1 }
 0x398   : > { %v1581_v35 = vmul.f32 %v2114_v15, %v3257_v31 }
 0x399   : > { %v2116_v19 = vpop.f32.mrf.mxu1 }
 0x39a   : > { %v1645_v11 = vadd.f32 %v1613_v37, %v1581_v35  ;;  %v2117_v18 = vadd.f32 %v2116_v19, %v2115_v52 }
 0x39b   : > { %v2028_v26 = vpop.f32.mrf.mxu0 }
 0x39c   : > { %1678 = vst.msk [vmem:[%s3264_s12 + $0xe0] sm:$0xff] %vm1649_vm2, %v1645_v11  ;;  %v1582_v48 = vmul.f32 %v2117_v18, %v3257_v31 }
 0x39d   : > { %v2029_v47 = vpop.f32.mrf.mxu0 }
 0x39e   : > { %v1646_v28 = vadd.f32 %v1614_v36, %v1582_v48  ;;  %v2030_v30 = vadd.f32 %v2029_v47, %v2028_v26 }
 0x39f   : > { %v2031_v44 = vpop.f32.mrf.mxu0 }
 0x3a0   : > { %1679 = vst.msk [vmem:[%s3264_s12 + $0xe8] sm:$0xff] %vm1649_vm2, %v1646_v28  ;;  %v1553_v51 = vmul.f32 %v2030_v30, %v3257_v31 }
 0x3a1   : > { %v2032_v62 = vpop.f32.mrf.mxu0 }
 0x3a2   : > { %v1617_v34 = vadd.f32 %v1585_v27, %v1553_v51  ;;  %v2033_v39 = vadd.f32 %v2032_v62, %v2031_v44 }
 0x3a4   : > { %v2118_v25 = vpop.f32.mrf.mxu1  ;;  %1650 = vst.msk [vmem:[%s3264_s12] sm:$0xff] %vm1649_vm2, %v1617_v34  ;;  %v1554_v60 = vmul.f32 %v2033_v39, %v3257_v31 }
 0x3a6   : > { %v2119_v43 = vpop.f32.mrf.mxu1  ;;  %v1618_v32 = vadd.f32 %v1586_v61, %v1554_v60 }
 0x3a7   : > { %v2120_v2 = vadd.f32 %v2119_v43, %v2118_v25 }
 0x3a8   : > { %v2121_v45 = vpop.f32.mrf.mxu1  ;;  %1651 = vst.msk [vmem:[%s3264_s12 + $0x8] sm:$0xff] %vm1649_vm2, %v1618_v32 }
 0x3a9   : > { %v1583_v57 = vmul.f32 %v2120_v2, %v3257_v31 }
 0x3aa   : > { %v2122_v41 = vpop.f32.mrf.mxu1 }
 0x3ab   : > { %v1647_v33 = vadd.f32 %v1615_v63, %v1583_v57  ;;  %v2123_v56 = vadd.f32 %v2122_v41, %v2121_v45 }
 0x3ad   : > { %1680 = vst.msk [vmem:[%s3264_s12 + $0xf0] sm:$0xff] %vm1649_vm2, %v1647_v33  ;;  %v1584_v20 = vmul.f32 %v2123_v56, %v3257_v31 }
 0x3af   : > { %v1648_v22 = vadd.f32 %v1616_v55, %v1584_v20 }
 0x3b1   : > { %1681 = vst.msk [vmem:[%s3264_s12 + $0xf8] sm:$0xff] %vm1649_vm2, %v1648_v22 }
 0x3b2 PF: > { %p2146_p4 = scmp.ge.s32.totalorder %s2500_s28, 2  ;;  %s1803_s8 = sand.u32 1, %s2480_s23  }
 0x3b3   : > { %s1804_s0 = scalar_lea.sflag [#allocation4], %s1803_s8 }
 0x3b4   : > { %p2143_p0 = pnand %p2146_p4, %p2591_p8 }
 0x3b6   : > { %p2144_p1 = pneg %p2143_p0 }
 0x3b8   : > { %2475 = dma.done.wait (%p2144_p1), %s1804_s0, 8192  }
 0x3b9   : > { %2477 = vsyncadd (%p2144_p1), %s1804_s0, 4294959104  ;;  %s21_s28 = sadd.s32 1, %s2500_s28   ;;  %s3508_s23 = smov %s2484_s24 }
 0x3ba   : > { %p18_p2 = scmp.ge.s32.totalorder %s21_s28, 4   ;;  %s3509_s24 = smov %s2488_s25 }
 0x3bb   : > { %s3510_s25 = smov %s2597_s11  ;;  %s3511_s26 = smov %s2496_s27 }
 0x3bc   : > { %s3512_s27 = smov %s3514_s30  ;;  %20 = sbr.rel (!%p18_p2) target bundleno = 6 (0x6), region = 96 }
 0x3c1   :  { %1809 = vsyncpa [#allocation4], 1 }
 0x3c2   :  { %1811 = vsyncpa [#allocation4 + $0x1], 1 }

</bundles_post_ra>
